<compile_context>
chip_gen: v7x
topology: tpu7x:2x2x1
jax: 0.10.0
libtpu: 0.0.40
codegen_flags: <defaults>
</compile_context>

<pallas_src>
import functools

import jax
import jax.numpy as jnp
from jax.experimental import pallas as pl
from jax.experimental.pallas import tpu as pltpu


def _round_up(x, m):
    return ((x + m - 1) // m) * m


# ----------------------------------------------------------------------------- kernels

def _mm_bias_act_kernel(w_ref, x_ref, b_ref, o_ref, *, relu):
    # w: (Nout, K) bf16, x: (K, tm) bf16, b: (Nout, 1) f32 -> o: (Nout, tm)
    acc = jnp.dot(w_ref[...], x_ref[...], preferred_element_type=jnp.float32)
    acc = acc + b_ref[...]
    if relu:
        acc = jnp.maximum(acc, 0.0)
    o_ref[...] = acc.astype(o_ref.dtype)


def matmul_bias_act(w_t, x_t, b, *, relu=True, out_dtype=jnp.bfloat16, tm=512):
    """out[Nout, M] = act(w_t @ x_t + b).

    Lane axis of the output is M (dense, unmasked stores).  Tiled over M with a 1-D
    "parallel" grid; Nout and K are tiny for this network so the weight / bias blocks
    stay resident across grid steps and K is not tiled (no scratch accumulator needed).
    """
    nout, k = w_t.shape
    k2, m = x_t.shape
    assert k == k2
    tm = min(tm, _round_up(m, 128))
    m_pad = _round_up(m, tm)
    if m_pad != m:
        x_t = jnp.pad(x_t, ((0, 0), (0, m_pad - m)))
    grid = (m_pad // tm,)
    itemsize = jnp.dtype(out_dtype).itemsize
    out = pl.pallas_call(
        functools.partial(_mm_bias_act_kernel, relu=relu),
        out_shape=jax.ShapeDtypeStruct((nout, m_pad), out_dtype),
        grid_spec=pltpu.PrefetchScalarGridSpec(
            num_scalar_prefetch=0,
            grid=grid,
            in_specs=[
                pl.BlockSpec((nout, k), lambda i: (0, 0)),   # weights: resident
                pl.BlockSpec((k, tm), lambda i: (0, i)),     # patches tile
                pl.BlockSpec((nout, 1), lambda i: (0, 0)),   # bias: resident
            ],
            out_specs=pl.BlockSpec((nout, tm), lambda i: (0, i)),
        ),
        compiler_params=pltpu.CompilerParams(
            dimension_semantics=("parallel",),               # shard M across TCs on v7x
            vmem_limit_bytes=32 * 1024 * 1024,               # explicit budget, safe on v7x 64 MiB
        ),
        cost_estimate=pl.CostEstimate(
            flops=2 * nout * k * m_pad,
            transcendentals=0,
            bytes_accessed=(nout * k + k * m_pad) * 2 + nout * 4 + nout * m_pad * itemsize,
        ),
    )(w_t.astype(jnp.bfloat16), x_t.astype(jnp.bfloat16),
      b.reshape(nout, 1).astype(jnp.float32))
    return out[:, :m] if m_pad != m else out


def _conv1_haar_kernel(w_ref, x_ref, hx_ref, b_ref, o_ref, res_ref):
    # conv1: (4, 27) bf16 @ (27, tm) bf16 -> (4, tm); f32 epilogue.
    acc = jnp.dot(w_ref[...], x_ref[...], preferred_element_type=jnp.float32)
    acc = jnp.maximum(acc + b_ref[...], 0.0)
    o_ref[...] = acc.astype(o_ref.dtype)
    # Haar detail energy from the 4 x (Cin, tm) f32 phase slabs (same pixels as the
    # conv patches): det = |LH| + |HL| + |HH|, averaged over input channels.
    pa = hx_ref[0]
    pb = hx_ref[1]
    pc = hx_ref[2]
    pd = hx_ref[3]
    lh = (pa - pb + pc - pd) * 0.5
    hl = (pa + pb - pc - pd) * 0.5
    hh = (pa - pb - pc + pd) * 0.5
    det = jnp.abs(lh) + jnp.abs(hl) + jnp.abs(hh)
    res_ref[...] = jnp.mean(det, axis=0, keepdims=True).astype(res_ref.dtype)


# ----------------------------------------------------------------------------- glue (im2col etc.)

def _im2col_t(x, k, stride, pad):
    """x: (C, N, H, W) -> patches^T (k*k*C, N*Ho*Wo).  Row ordering: tap-major, channel-minor."""
    c, n, h, w = x.shape
    xp = jnp.pad(x, ((0, 0), (0, 0), (pad, pad), (pad, pad)))
    ho = (h + 2 * pad - k) // stride + 1
    wo = (w + 2 * pad - k) // stride + 1
    cols = []
    for i in range(k):
        for j in range(k):
            cols.append(xp[:, :, i:i + stride * (ho - 1) + 1:stride,
                              j:j + stride * (wo - 1) + 1:stride])
    p = jnp.stack(cols, axis=0)                        # (k*k, C, N, Ho, Wo)
    return p.reshape(k * k * c, n * ho * wo), ho, wo


def conv2d(x, w, b, *, stride=2, pad=1, relu=True, out_dtype=jnp.bfloat16):
    """x: (Cin, N, H, W); w: PyTorch Conv2d weight (Cout, Cin, k, k) -> (Cout, N, Ho, Wo)."""
    cout, cin, k, _ = w.shape
    _, n, h, wd = x.shape
    w_t = jnp.transpose(w, (0, 2, 3, 1)).reshape(cout, k * k * cin)
    patches, ho, wo = _im2col_t(x, k, stride, pad)
    out = matmul_bias_act(w_t, patches, b, relu=relu, out_dtype=out_dtype)
    return out.reshape(cout, n, ho, wo)


def _deconv_phase_matrix(w_t):
    """PyTorch ConvTranspose2d(k=4, stride=2, pad=1) weight (Cin, Cout, 4, 4) ->
    sub-pixel matrix (4*Cout, 9*Cin).  Each of the 4 output phases (row/col parity)
    is a stride-1 conv with a 2x2 sub-kernel of w; embedding all four in a shared
    3x3/pad-1 patch lets one matmul produce every phase with no zero-dilation."""
    cin, cout = w_t.shape[:2]

    def pick_rows(wk, r):
        # r=0 (even out rows): patch rows (0,1) use kernel taps p=(3,1); row 2 unused.
        # r=1 (odd  out rows): patch rows (1,2) use kernel taps p=(2,0); row 0 unused.
        idx = (3, 1) if r == 0 else (2, 0)
        sub = jnp.stack([wk[:, :, idx[0], :], wk[:, :, idx[1], :]], axis=2)    # (Cin,Cout,2,4)
        padr = ((0, 0), (0, 0), (0, 1), (0, 0)) if r == 0 else ((0, 0), (0, 0), (1, 0), (0, 0))
        return jnp.pad(sub, padr)                                               # (Cin,Cout,3,4)

    def pick_cols(wk, s):
        idx = (3, 1) if s == 0 else (2, 0)
        sub = jnp.stack([wk[:, :, :, idx[0]], wk[:, :, :, idx[1]]], axis=3)     # (Cin,Cout,3,2)
        padc = ((0, 0), (0, 0), (0, 0), (0, 1)) if s == 0 else ((0, 0), (0, 0), (0, 0), (1, 0))
        return jnp.pad(sub, padc)                                               # (Cin,Cout,3,3)

    mats = []
    for r in (0, 1):
        for s in (0, 1):
            k33 = pick_cols(pick_rows(w_t, r), s)                               # (Cin,Cout,3,3)
            mats.append(jnp.transpose(k33, (1, 2, 3, 0)).reshape(cout, 9 * cin))
    return jnp.concatenate(mats, axis=0)                                        # (4*Cout, 9*Cin)


def conv_transpose2d(x, w_t, b, *, relu=True, out_dtype=jnp.bfloat16):
    """ConvTranspose2d(k=4, stride=2, pad=1) (+ReLU) via sub-pixel decomposition.
    x: (Cin, N, H, W); w_t: PyTorch layout (Cin, Cout, 4, 4) -> (Cout, N, 2H, 2W)."""
    cin, n, h, wd = x.shape
    cout = w_t.shape[1]
    w_emb = _deconv_phase_matrix(w_t)                      # (4*Cout, 9*Cin)
    b_emb = jnp.tile(b.reshape(1, cout), (4, 1)).reshape(4 * cout)
    patches, _, _ = _im2col_t(x, 3, 1, 1)                  # (9*Cin, N*H*W)
    out = matmul_bias_act(w_emb, patches, b_emb, relu=relu, out_dtype=out_dtype)
    out = out.reshape(2, 2, cout, n, h, wd)                # (r, s, Cout, N, H, W)
    out = jnp.transpose(out, (2, 3, 4, 0, 5, 1)).reshape(cout, n, 2 * h, 2 * wd)
    return out


def conv1_haar(x, w, bias, *, tm=512):
    """Fused conv1 (3->4, k3 s2 p1, ReLU) + 1-channel Haar detail-energy residual.

    x: (3, N, H, W) f32; w: (4, 3, 3, 3).  The Haar 2x2 phases a,b,c,d are exactly the
    (1,1),(1,2),(2,1),(2,2) taps of the stride-2/pad-1 im2col patches, so conv output
    and residual share one kernel launch and one patch pass.
    Returns out (4, N, H/2, W/2) bf16 and res (1, N, H/2, W/2) f32.
    """
    cout, cin, k, _ = w.shape
    _, n, h, wd = x.shape
    w_t = jnp.transpose(w, (0, 2, 3, 1)).reshape(cout, k * k * cin)
    patches, ho, wo = _im2col_t(x, k, 2, 1)                # (27, M) f32
    m = patches.shape[1]

    def tap(ki, kj):
        s = (ki * k + kj) * cin
        return patches[s:s + cin]                          # (Cin, M)

    hx = jnp.stack([tap(1, 1), tap(1, 2), tap(2, 1), tap(2, 2)], axis=0)   # (4, Cin, M) f32

    tm = min(tm, _round_up(m, 128))
    m_pad = _round_up(m, tm)
    if m_pad != m:
        patches = jnp.pad(patches, ((0, 0), (0, m_pad - m)))
        hx = jnp.pad(hx, ((0, 0), (0, 0), (0, m_pad - m)))
    grid = (m_pad // tm,)

    out, res = pl.pallas_call(
        _conv1_haar_kernel,
        out_shape=(jax.ShapeDtypeStruct((cout, m_pad), jnp.bfloat16),
                   jax.ShapeDtypeStruct((1, m_pad), jnp.float32)),
        grid_spec=pltpu.PrefetchScalarGridSpec(
            num_scalar_prefetch=0,
            grid=grid,
            in_specs=[
                pl.BlockSpec((cout, k * k * cin), lambda i: (0, 0)),
                pl.BlockSpec((k * k * cin, tm), lambda i: (0, i)),
                pl.BlockSpec((4, cin, tm), lambda i: (0, 0, i)),
                pl.BlockSpec((cout, 1), lambda i: (0, 0)),
            ],
            out_specs=(pl.BlockSpec((cout, tm), lambda i: (0, i)),
                       pl.BlockSpec((1, tm), lambda i: (0, i))),
        ),
        compiler_params=pltpu.CompilerParams(
            dimension_semantics=("parallel",),
            vmem_limit_bytes=32 * 1024 * 1024,
        ),
    )(w_t.astype(jnp.bfloat16), patches.astype(jnp.bfloat16),
      hx.astype(jnp.float32), bias.reshape(cout, 1).astype(jnp.float32))

    if m_pad != m:
        out = out[:, :m]
        res = res[:, :m]
    return out.reshape(cout, n, ho, wo), res.reshape(1, n, ho, wo)


# ----------------------------------------------------------------------------- model

def init_params(key):
    def conv_init(key, cout, cin, k):
        kw, kb = jax.random.split(key)
        scale = 1.0 / jnp.sqrt(cin * k * k)
        w = jax.random.normal(kw, (cout, cin, k, k), jnp.float32) * scale      # PyTorch Conv2d layout
        b = jax.random.normal(kb, (cout,), jnp.float32) * scale
        return w, b

    def deconv_init(key, cin, cout, k):
        kw, kb = jax.random.split(key)
        scale = 1.0 / jnp.sqrt(cin * k * k)
        w = jax.random.normal(kw, (cin, cout, k, k), jnp.float32) * scale      # PyTorch ConvTranspose2d layout
        b = jax.random.normal(kb, (cout,), jnp.float32) * scale
        return w, b

    keys = jax.random.split(key, 6)
    p = {}
    p["conv1_w"], p["conv1_b"] = conv_init(keys[0], 4, 3, 3)
    p["conv2_w"], p["conv2_b"] = conv_init(keys[1], 16, 4, 3)
    p["conv3_w"], p["conv3_b"] = conv_init(keys[2], 32, 16, 3)
    p["deconv2_w"], p["deconv2_b"] = deconv_init(keys[3], 32, 16, 4)
    p["deconv3_w"], p["deconv3_b"] = deconv_init(keys[4], 16, 4, 4)
    p["deconv4_w"], p["deconv4_b"] = deconv_init(keys[5], 5, 3, 4)
    return p


def baseline_forward(p, x_nchw):
    # TODO(synk): the plt.imsave debug dumps in the reference forward() are I/O side
    # effects with no compute semantics and are intentionally omitted.
    x = jnp.transpose(x_nchw, (1, 0, 2, 3)).astype(jnp.float32)        # NCHW -> CNHW

    h, res = conv1_haar(x, p["conv1_w"], p["conv1_b"])                 # (4,N,H/2,W/2), (1,N,H/2,W/2)
    h = conv2d(h, p["conv2_w"], p["conv2_b"])                          # (16,N,H/4,W/4)
    h = conv2d(h, p["conv3_w"], p["conv3_b"])                          # (32,N,H/8,W/8)
    h = conv_transpose2d(h, p["deconv2_w"], p["deconv2_b"])            # (16,N,H/4,W/4)
    h = conv_transpose2d(h, p["deconv3_w"], p["deconv3_b"])            # (4,N,H/2,W/2)
    h = jnp.concatenate([h, res.astype(h.dtype)], axis=0)              # (5,N,H/2,W/2)
    # TODO(synk): the reference TransposedCNNBlock2d is assumed to apply ReLU on the
    # final block as well (not verifiable from the provided spec).
    h = conv_transpose2d(h, p["deconv4_w"], p["deconv4_b"], out_dtype=jnp.float32)  # (3,N,H,W)
    return jnp.transpose(h, (1, 0, 2, 3))                              # CNHW -> NCHW


# ----------------------------------------------------------------------------- main

if __name__ == "__main__":
    key = jax.random.PRNGKey(0)
    kp, kx = jax.random.split(key)
    params = init_params(kp)

    # Small deterministic input, PyTorch NCHW convention: (batch=2, C=3, H=16, W=16).
    x = jax.random.normal(kx, (2, 3, 16, 16), jnp.float32)

    out = jax.jit(baseline_forward)(params, x)
    out = jax.block_until_ready(out)
    assert out.shape == (2, 3, 16, 16), out.shape
    assert bool(jnp.all(jnp.isfinite(out)))
    print("KERNEL_OK")
</pallas_src>

<mosaic_0001>
module attributes {stable_mosaic.version = 11 : i64} {
  func.func @_conv1_haar_kernel(%arg0: i32, %arg1: memref<4x27xbf16, #tpu.memory_space<vmem>>, %arg2: memref<27x128xbf16, #tpu.memory_space<vmem>>, %arg3: memref<4x3x128xf32, #tpu.memory_space<vmem>>, %arg4: memref<4x1xf32, #tpu.memory_space<vmem>>, %arg5: memref<4x128xbf16, #tpu.memory_space<vmem>>, %arg6: memref<1x128xf32, #tpu.memory_space<vmem>>) attributes {dimension_semantics = [#tpu.dimension_semantics<parallel>], iteration_bounds = array<i64: 1>, scalar_prefetch = 0 : i64, scratch_operands = 0 : i64, tpu.core_type = #tpu.core_type<tc>, window_params = [{pipeline_mode = #tpu.pipeline_mode<synchronous>, transform_indices = @transform_0, window_bounds = array<i64: 4, 27>}, {transform_indices = @transform_1, window_bounds = array<i64: 27, 128>}, {transform_indices = @transform_2, window_bounds = array<i64: 4, 3, 128>}, {pipeline_mode = #tpu.pipeline_mode<synchronous>, transform_indices = @transform_3, window_bounds = array<i64: 4, 1>}, {transform_indices = @transform_4, window_bounds = array<i64: 4, 128>}, {transform_indices = @transform_5, window_bounds = array<i64: 1, 128>}]} {
    %c0 = arith.constant 0 : index
    %c0_0 = arith.constant 0 : index
    %0 = vector.load %arg1[%c0, %c0_0] : memref<4x27xbf16, #tpu.memory_space<vmem>>, vector<4x27xbf16>
    %c0_1 = arith.constant 0 : index
    %c0_2 = arith.constant 0 : index
    %1 = vector.load %arg2[%c0_1, %c0_2] : memref<27x128xbf16, #tpu.memory_space<vmem>>, vector<27x128xbf16>
    %cst = arith.constant dense<0.000000e+00> : vector<4x128xf32>
    %2 = tpu.matmul %0, %1, %cst {dimension_numbers = #tpu.dot_dimension_numbers<[1], [0], [0], [1], [0, 0, 1, 1], [], []>} : vector<4x27xbf16>, vector<27x128xbf16>, vector<4x128xf32> -> vector<4x128xf32>
    %c0_3 = arith.constant 0 : index
    %c0_4 = arith.constant 0 : index
    %3 = vector.load %arg4[%c0_3, %c0_4] : memref<4x1xf32, #tpu.memory_space<vmem>>, vector<4x1xf32>
    %4 = vector.broadcast %3 : vector<4x1xf32> to vector<4x128xf32>
    %5 = arith.addf %2, %4 : vector<4x128xf32>
    %cst_5 = arith.constant 0.000000e+00 : f32
    %6 = vector.broadcast %cst_5 : f32 to vector<4x128xf32>
    %7 = arith.maximumf %5, %6 : vector<4x128xf32>
    %8 = arith.truncf %7 : vector<4x128xf32> to vector<4x128xbf16>
    %c0_6 = arith.constant 0 : index
    %c0_7 = arith.constant 0 : index
    %9 = vector.load %arg5[%c0_6, %c0_7] : memref<4x128xbf16, #tpu.memory_space<vmem>>, vector<4x128xbf16>
    tpu.vector_store %arg5[%c0_6, %c0_7], %8 {strides = array<i32>} : memref<4x128xbf16, #tpu.memory_space<vmem>>, vector<4x128xbf16>,
    %c0_8 = arith.constant 0 : index
    %c0_9 = arith.constant 0 : index
    %c0_10 = arith.constant 0 : index
    %10 = vector.load %arg3[%c0_8, %c0_9, %c0_10] : memref<4x3x128xf32, #tpu.memory_space<vmem>>, vector<1x3x128xf32>
    %11 = vector.shape_cast %10 : vector<1x3x128xf32> to vector<3x128xf32>
    %c1 = arith.constant 1 : index
    %c0_11 = arith.constant 0 : index
    %c0_12 = arith.constant 0 : index
    %12 = vector.load %arg3[%c1, %c0_11, %c0_12] : memref<4x3x128xf32, #tpu.memory_space<vmem>>, vector<1x3x128xf32>
    %13 = vector.shape_cast %12 : vector<1x3x128xf32> to vector<3x128xf32>
    %c2 = arith.constant 2 : index
    %c0_13 = arith.constant 0 : index
    %c0_14 = arith.constant 0 : index
    %14 = vector.load %arg3[%c2, %c0_13, %c0_14] : memref<4x3x128xf32, #tpu.memory_space<vmem>>, vector<1x3x128xf32>
    %15 = vector.shape_cast %14 : vector<1x3x128xf32> to vector<3x128xf32>
    %c3 = arith.constant 3 : index
    %c0_15 = arith.constant 0 : index
    %c0_16 = arith.constant 0 : index
    %16 = vector.load %arg3[%c3, %c0_15, %c0_16] : memref<4x3x128xf32, #tpu.memory_space<vmem>>, vector<1x3x128xf32>
    %17 = vector.shape_cast %16 : vector<1x3x128xf32> to vector<3x128xf32>
    %18 = arith.subf %11, %13 : vector<3x128xf32>
    %19 = arith.addf %18, %15 : vector<3x128xf32>
    %20 = arith.subf %19, %17 : vector<3x128xf32>
    %cst_17 = arith.constant 5.000000e-01 : f32
    %21 = vector.broadcast %cst_17 : f32 to vector<3x128xf32>
    %22 = arith.mulf %20, %21 : vector<3x128xf32>
    %23 = arith.addf %11, %13 : vector<3x128xf32>
    %24 = arith.subf %23, %15 : vector<3x128xf32>
    %25 = arith.subf %24, %17 : vector<3x128xf32>
    %cst_18 = arith.constant 5.000000e-01 : f32
    %26 = vector.broadcast %cst_18 : f32 to vector<3x128xf32>
    %27 = arith.mulf %25, %26 : vector<3x128xf32>
    %28 = arith.subf %11, %13 : vector<3x128xf32>
    %29 = arith.subf %28, %15 : vector<3x128xf32>
    %30 = arith.addf %29, %17 : vector<3x128xf32>
    %cst_19 = arith.constant 5.000000e-01 : f32
    %31 = vector.broadcast %cst_19 : f32 to vector<3x128xf32>
    %32 = arith.mulf %30, %31 : vector<3x128xf32>
    %33 = math.absf %22 : vector<3x128xf32>
    %34 = math.absf %27 : vector<3x128xf32>
    %35 = arith.addf %33, %34 : vector<3x128xf32>
    %36 = math.absf %32 : vector<3x128xf32>
    %37 = arith.addf %35, %36 : vector<3x128xf32>
    %cst_20 = arith.constant dense<0.000000e+00> : vector<128xf32>
    %38 = vector.multi_reduction <add>, %37, %cst_20 [0] : vector<3x128xf32> to vector<128xf32>
    %39 = vector.shape_cast %38 : vector<128xf32> to vector<1x128xf32>
    %cst_21 = arith.constant 3.000000e+00 : f32
    %40 = vector.broadcast %cst_21 : f32 to vector<1x128xf32>
    %41 = arith.divf %39, %40 : vector<1x128xf32>
    %c0_22 = arith.constant 0 : index
    %c0_23 = arith.constant 0 : index
    %42 = vector.load %arg6[%c0_22, %c0_23] : memref<1x128xf32, #tpu.memory_space<vmem>>, vector<1x128xf32>
    tpu.vector_store %arg6[%c0_22, %c0_23], %41 {strides = array<i32>} : memref<1x128xf32, #tpu.memory_space<vmem>>, vector<1x128xf32>,
    return
  }
  func.func @transform_0(%arg0: i32) -> (i32, i32) {
    %c0_i32 = arith.constant 0 : i32
    %c0_i32_0 = arith.constant 0 : i32
    %c0_i32_1 = arith.constant 0 : i32
    return %c0_i32, %c0_i32_0 : i32, i32
  }
  func.func @transform_1(%arg0: i32) -> (i32, i32) {
    %c0_i32 = arith.constant 0 : i32
    %c0_i32_0 = arith.constant 0 : i32
    return %c0_i32, %arg0 : i32, i32
  }
  func.func @transform_2(%arg0: i32) -> (i32, i32, i32) {
    %c0_i32 = arith.constant 0 : i32
    %c0_i32_0 = arith.constant 0 : i32
    %c0_i32_1 = arith.constant 0 : i32
    return %c0_i32, %c0_i32_0, %arg0 : i32, i32, i32
  }
  func.func @transform_3(%arg0: i32) -> (i32, i32) {
    %c0_i32 = arith.constant 0 : i32
    %c0_i32_0 = arith.constant 0 : i32
    %c0_i32_1 = arith.constant 0 : i32
    return %c0_i32, %c0_i32_0 : i32, i32
  }
  func.func @transform_4(%arg0: i32) -> (i32, i32) {
    %c0_i32 = arith.constant 0 : i32
    %c0_i32_0 = arith.constant 0 : i32
    return %c0_i32, %arg0 : i32, i32
  }
  func.func @transform_5(%arg0: i32) -> (i32, i32) {
    %c0_i32 = arith.constant 0 : i32
    %c0_i32_0 = arith.constant 0 : i32
    return %c0_i32, %arg0 : i32, i32
  }
}

module attributes {stable_mosaic.version = 11 : i64} {
  func.func @_mm_bias_act_kernel(%arg0: i32, %arg1: memref<16x36xbf16, #tpu.memory_space<vmem>>, %arg2: memref<36x128xbf16, #tpu.memory_space<vmem>>, %arg3: memref<16x1xf32, #tpu.memory_space<vmem>>, %arg4: memref<16x128xbf16, #tpu.memory_space<vmem>>) attributes {dimension_semantics = [#tpu.dimension_semantics<parallel>], iteration_bounds = array<i64: 1>, scalar_prefetch = 0 : i64, scratch_operands = 0 : i64, tpu.core_type = #tpu.core_type<tc>, window_params = [{pipeline_mode = #tpu.pipeline_mode<synchronous>, transform_indices = @transform_0, window_bounds = array<i64: 16, 36>}, {transform_indices = @transform_1, window_bounds = array<i64: 36, 128>}, {pipeline_mode = #tpu.pipeline_mode<synchronous>, transform_indices = @transform_2, window_bounds = array<i64: 16, 1>}, {transform_indices = @transform_3, window_bounds = array<i64: 16, 128>}]} {
    %c0 = arith.constant 0 : index
    %c0_0 = arith.constant 0 : index
    %0 = vector.load %arg1[%c0, %c0_0] : memref<16x36xbf16, #tpu.memory_space<vmem>>, vector<16x36xbf16>
    %c0_1 = arith.constant 0 : index
    %c0_2 = arith.constant 0 : index
    %1 = vector.load %arg2[%c0_1, %c0_2] : memref<36x128xbf16, #tpu.memory_space<vmem>>, vector<36x128xbf16>
    %cst = arith.constant dense<0.000000e+00> : vector<16x128xf32>
    %2 = tpu.matmul %0, %1, %cst {dimension_numbers = #tpu.dot_dimension_numbers<[1], [0], [0], [1], [0, 0, 1, 1], [], []>} : vector<16x36xbf16>, vector<36x128xbf16>, vector<16x128xf32> -> vector<16x128xf32>
    %c0_3 = arith.constant 0 : index
    %c0_4 = arith.constant 0 : index
    %3 = vector.load %arg3[%c0_3, %c0_4] : memref<16x1xf32, #tpu.memory_space<vmem>>, vector<16x1xf32>
    %4 = vector.broadcast %3 : vector<16x1xf32> to vector<16x128xf32>
    %5 = arith.addf %2, %4 : vector<16x128xf32>
    %cst_5 = arith.constant 0.000000e+00 : f32
    %6 = vector.broadcast %cst_5 : f32 to vector<16x128xf32>
    %7 = arith.maximumf %5, %6 : vector<16x128xf32>
    %8 = arith.truncf %7 : vector<16x128xf32> to vector<16x128xbf16>
    %c0_6 = arith.constant 0 : index
    %c0_7 = arith.constant 0 : index
    %9 = vector.load %arg4[%c0_6, %c0_7] : memref<16x128xbf16, #tpu.memory_space<vmem>>, vector<16x128xbf16>
    tpu.vector_store %arg4[%c0_6, %c0_7], %8 {strides = array<i32>} : memref<16x128xbf16, #tpu.memory_space<vmem>>, vector<16x128xbf16>,
    return
  }
  func.func @transform_0(%arg0: i32) -> (i32, i32) {
    %c0_i32 = arith.constant 0 : i32
    %c0_i32_0 = arith.constant 0 : i32
    %c0_i32_1 = arith.constant 0 : i32
    return %c0_i32, %c0_i32_0 : i32, i32
  }
  func.func @transform_1(%arg0: i32) -> (i32, i32) {
    %c0_i32 = arith.constant 0 : i32
    %c0_i32_0 = arith.constant 0 : i32
    return %c0_i32, %arg0 : i32, i32
  }
  func.func @transform_2(%arg0: i32) -> (i32, i32) {
    %c0_i32 = arith.constant 0 : i32
    %c0_i32_0 = arith.constant 0 : i32
    %c0_i32_1 = arith.constant 0 : i32
    return %c0_i32, %c0_i32_0 : i32, i32
  }
  func.func @transform_3(%arg0: i32) -> (i32, i32) {
    %c0_i32 = arith.constant 0 : i32
    %c0_i32_0 = arith.constant 0 : i32
    return %c0_i32, %arg0 : i32, i32
  }
}

module attributes {stable_mosaic.version = 11 : i64} {
  func.func @_mm_bias_act_kernel(%arg0: i32, %arg1: memref<32x144xbf16, #tpu.memory_space<vmem>>, %arg2: memref<144x128xbf16, #tpu.memory_space<vmem>>, %arg3: memref<32x1xf32, #tpu.memory_space<vmem>>, %arg4: memref<32x128xbf16, #tpu.memory_space<vmem>>) attributes {dimension_semantics = [#tpu.dimension_semantics<parallel>], iteration_bounds = array<i64: 1>, scalar_prefetch = 0 : i64, scratch_operands = 0 : i64, tpu.core_type = #tpu.core_type<tc>, window_params = [{pipeline_mode = #tpu.pipeline_mode<synchronous>, transform_indices = @transform_0, window_bounds = array<i64: 32, 144>}, {transform_indices = @transform_1, window_bounds = array<i64: 144, 128>}, {pipeline_mode = #tpu.pipeline_mode<synchronous>, transform_indices = @transform_2, window_bounds = array<i64: 32, 1>}, {transform_indices = @transform_3, window_bounds = array<i64: 32, 128>}]} {
    %c0 = arith.constant 0 : index
    %c0_0 = arith.constant 0 : index
    %0 = vector.load %arg1[%c0, %c0_0] : memref<32x144xbf16, #tpu.memory_space<vmem>>, vector<32x144xbf16>
    %c0_1 = arith.constant 0 : index
    %c0_2 = arith.constant 0 : index
    %1 = vector.load %arg2[%c0_1, %c0_2] : memref<144x128xbf16, #tpu.memory_space<vmem>>, vector<144x128xbf16>
    %cst = arith.constant dense<0.000000e+00> : vector<32x128xf32>
    %2 = tpu.matmul %0, %1, %cst {dimension_numbers = #tpu.dot_dimension_numbers<[1], [0], [0], [1], [0, 0, 1, 1], [], []>} : vector<32x144xbf16>, vector<144x128xbf16>, vector<32x128xf32> -> vector<32x128xf32>
    %c0_3 = arith.constant 0 : index
    %c0_4 = arith.constant 0 : index
    %3 = vector.load %arg3[%c0_3, %c0_4] : memref<32x1xf32, #tpu.memory_space<vmem>>, vector<32x1xf32>
    %4 = vector.broadcast %3 : vector<32x1xf32> to vector<32x128xf32>
    %5 = arith.addf %2, %4 : vector<32x128xf32>
    %cst_5 = arith.constant 0.000000e+00 : f32
    %6 = vector.broadcast %cst_5 : f32 to vector<32x128xf32>
    %7 = arith.maximumf %5, %6 : vector<32x128xf32>
    %8 = arith.truncf %7 : vector<32x128xf32> to vector<32x128xbf16>
    %c0_6 = arith.constant 0 : index
    %c0_7 = arith.constant 0 : index
    %9 = vector.load %arg4[%c0_6, %c0_7] : memref<32x128xbf16, #tpu.memory_space<vmem>>, vector<32x128xbf16>
    tpu.vector_store %arg4[%c0_6, %c0_7], %8 {strides = array<i32>} : memref<32x128xbf16, #tpu.memory_space<vmem>>, vector<32x128xbf16>,
    return
  }
  func.func @transform_0(%arg0: i32) -> (i32, i32) {
    %c0_i32 = arith.constant 0 : i32
    %c0_i32_0 = arith.constant 0 : i32
    %c0_i32_1 = arith.constant 0 : i32
    return %c0_i32, %c0_i32_0 : i32, i32
  }
  func.func @transform_1(%arg0: i32) -> (i32, i32) {
    %c0_i32 = arith.constant 0 : i32
    %c0_i32_0 = arith.constant 0 : i32
    return %c0_i32, %arg0 : i32, i32
  }
  func.func @transform_2(%arg0: i32) -> (i32, i32) {
    %c0_i32 = arith.constant 0 : i32
    %c0_i32_0 = arith.constant 0 : i32
    %c0_i32_1 = arith.constant 0 : i32
    return %c0_i32, %c0_i32_0 : i32, i32
  }
  func.func @transform_3(%arg0: i32) -> (i32, i32) {
    %c0_i32 = arith.constant 0 : i32
    %c0_i32_0 = arith.constant 0 : i32
    return %c0_i32, %arg0 : i32, i32
  }
}

module attributes {stable_mosaic.version = 11 : i64} {
  func.func @_mm_bias_act_kernel(%arg0: i32, %arg1: memref<64x288xbf16, #tpu.memory_space<vmem>>, %arg2: memref<288x128xbf16, #tpu.memory_space<vmem>>, %arg3: memref<64x1xf32, #tpu.memory_space<vmem>>, %arg4: memref<64x128xbf16, #tpu.memory_space<vmem>>) attributes {dimension_semantics = [#tpu.dimension_semantics<parallel>], iteration_bounds = array<i64: 1>, scalar_prefetch = 0 : i64, scratch_operands = 0 : i64, tpu.core_type = #tpu.core_type<tc>, window_params = [{pipeline_mode = #tpu.pipeline_mode<synchronous>, transform_indices = @transform_0, window_bounds = array<i64: 64, 288>}, {transform_indices = @transform_1, window_bounds = array<i64: 288, 128>}, {pipeline_mode = #tpu.pipeline_mode<synchronous>, transform_indices = @transform_2, window_bounds = array<i64: 64, 1>}, {transform_indices = @transform_3, window_bounds = array<i64: 64, 128>}]} {
    %c0 = arith.constant 0 : index
    %c0_0 = arith.constant 0 : index
    %0 = vector.load %arg1[%c0, %c0_0] : memref<64x288xbf16, #tpu.memory_space<vmem>>, vector<64x288xbf16>
    %c0_1 = arith.constant 0 : index
    %c0_2 = arith.constant 0 : index
    %1 = vector.load %arg2[%c0_1, %c0_2] : memref<288x128xbf16, #tpu.memory_space<vmem>>, vector<288x128xbf16>
    %cst = arith.constant dense<0.000000e+00> : vector<64x128xf32>
    %2 = tpu.matmul %0, %1, %cst {dimension_numbers = #tpu.dot_dimension_numbers<[1], [0], [0], [1], [0, 0, 1, 1], [], []>} : vector<64x288xbf16>, vector<288x128xbf16>, vector<64x128xf32> -> vector<64x128xf32>
    %c0_3 = arith.constant 0 : index
    %c0_4 = arith.constant 0 : index
    %3 = vector.load %arg3[%c0_3, %c0_4] : memref<64x1xf32, #tpu.memory_space<vmem>>, vector<64x1xf32>
    %4 = vector.broadcast %3 : vector<64x1xf32> to vector<64x128xf32>
    %5 = arith.addf %2, %4 : vector<64x128xf32>
    %cst_5 = arith.constant 0.000000e+00 : f32
    %6 = vector.broadcast %cst_5 : f32 to vector<64x128xf32>
    %7 = arith.maximumf %5, %6 : vector<64x128xf32>
    %8 = arith.truncf %7 : vector<64x128xf32> to vector<64x128xbf16>
    %c0_6 = arith.constant 0 : index
    %c0_7 = arith.constant 0 : index
    %9 = vector.load %arg4[%c0_6, %c0_7] : memref<64x128xbf16, #tpu.memory_space<vmem>>, vector<64x128xbf16>
    tpu.vector_store %arg4[%c0_6, %c0_7], %8 {strides = array<i32>} : memref<64x128xbf16, #tpu.memory_space<vmem>>, vector<64x128xbf16>,
    return
  }
  func.func @transform_0(%arg0: i32) -> (i32, i32) {
    %c0_i32 = arith.constant 0 : i32
    %c0_i32_0 = arith.constant 0 : i32
    %c0_i32_1 = arith.constant 0 : i32
    return %c0_i32, %c0_i32_0 : i32, i32
  }
  func.func @transform_1(%arg0: i32) -> (i32, i32) {
    %c0_i32 = arith.constant 0 : i32
    %c0_i32_0 = arith.constant 0 : i32
    return %c0_i32, %arg0 : i32, i32
  }
  func.func @transform_2(%arg0: i32) -> (i32, i32) {
    %c0_i32 = arith.constant 0 : i32
    %c0_i32_0 = arith.constant 0 : i32
    %c0_i32_1 = arith.constant 0 : i32
    return %c0_i32, %c0_i32_0 : i32, i32
  }
  func.func @transform_3(%arg0: i32) -> (i32, i32) {
    %c0_i32 = arith.constant 0 : i32
    %c0_i32_0 = arith.constant 0 : i32
    return %c0_i32, %arg0 : i32, i32
  }
}

module attributes {stable_mosaic.version = 11 : i64} {
  func.func @_mm_bias_act_kernel(%arg0: i32, %arg1: memref<16x144xbf16, #tpu.memory_space<vmem>>, %arg2: memref<144x128xbf16, #tpu.memory_space<vmem>>, %arg3: memref<16x1xf32, #tpu.memory_space<vmem>>, %arg4: memref<16x128xbf16, #tpu.memory_space<vmem>>) attributes {dimension_semantics = [#tpu.dimension_semantics<parallel>], iteration_bounds = array<i64: 1>, scalar_prefetch = 0 : i64, scratch_operands = 0 : i64, tpu.core_type = #tpu.core_type<tc>, window_params = [{pipeline_mode = #tpu.pipeline_mode<synchronous>, transform_indices = @transform_0, window_bounds = array<i64: 16, 144>}, {transform_indices = @transform_1, window_bounds = array<i64: 144, 128>}, {pipeline_mode = #tpu.pipeline_mode<synchronous>, transform_indices = @transform_2, window_bounds = array<i64: 16, 1>}, {transform_indices = @transform_3, window_bounds = array<i64: 16, 128>}]} {
    %c0 = arith.constant 0 : index
    %c0_0 = arith.constant 0 : index
    %0 = vector.load %arg1[%c0, %c0_0] : memref<16x144xbf16, #tpu.memory_space<vmem>>, vector<16x144xbf16>
    %c0_1 = arith.constant 0 : index
    %c0_2 = arith.constant 0 : index
    %1 = vector.load %arg2[%c0_1, %c0_2] : memref<144x128xbf16, #tpu.memory_space<vmem>>, vector<144x128xbf16>
    %cst = arith.constant dense<0.000000e+00> : vector<16x128xf32>
    %2 = tpu.matmul %0, %1, %cst {dimension_numbers = #tpu.dot_dimension_numbers<[1], [0], [0], [1], [0, 0, 1, 1], [], []>} : vector<16x144xbf16>, vector<144x128xbf16>, vector<16x128xf32> -> vector<16x128xf32>
    %c0_3 = arith.constant 0 : index
    %c0_4 = arith.constant 0 : index
    %3 = vector.load %arg3[%c0_3, %c0_4] : memref<16x1xf32, #tpu.memory_space<vmem>>, vector<16x1xf32>
    %4 = vector.broadcast %3 : vector<16x1xf32> to vector<16x128xf32>
    %5 = arith.addf %2, %4 : vector<16x128xf32>
    %cst_5 = arith.constant 0.000000e+00 : f32
    %6 = vector.broadcast %cst_5 : f32 to vector<16x128xf32>
    %7 = arith.maximumf %5, %6 : vector<16x128xf32>
    %8 = arith.truncf %7 : vector<16x128xf32> to vector<16x128xbf16>
    %c0_6 = arith.constant 0 : index
    %c0_7 = arith.constant 0 : index
    %9 = vector.load %arg4[%c0_6, %c0_7] : memref<16x128xbf16, #tpu.memory_space<vmem>>, vector<16x128xbf16>
    tpu.vector_store %arg4[%c0_6, %c0_7], %8 {strides = array<i32>} : memref<16x128xbf16, #tpu.memory_space<vmem>>, vector<16x128xbf16>,
    return
  }
  func.func @transform_0(%arg0: i32) -> (i32, i32) {
    %c0_i32 = arith.constant 0 : i32
    %c0_i32_0 = arith.constant 0 : i32
    %c0_i32_1 = arith.constant 0 : i32
    return %c0_i32, %c0_i32_0 : i32, i32
  }
  func.func @transform_1(%arg0: i32) -> (i32, i32) {
    %c0_i32 = arith.constant 0 : i32
    %c0_i32_0 = arith.constant 0 : i32
    return %c0_i32, %arg0 : i32, i32
  }
  func.func @transform_2(%arg0: i32) -> (i32, i32) {
    %c0_i32 = arith.constant 0 : i32
    %c0_i32_0 = arith.constant 0 : i32
    %c0_i32_1 = arith.constant 0 : i32
    return %c0_i32, %c0_i32_0 : i32, i32
  }
  func.func @transform_3(%arg0: i32) -> (i32, i32) {
    %c0_i32 = arith.constant 0 : i32
    %c0_i32_0 = arith.constant 0 : i32
    return %c0_i32, %arg0 : i32, i32
  }
}

module attributes {stable_mosaic.version = 11 : i64} {
  func.func @_mm_bias_act_kernel(%arg0: i32, %arg1: memref<12x45xbf16, #tpu.memory_space<vmem>>, %arg2: memref<45x128xbf16, #tpu.memory_space<vmem>>, %arg3: memref<12x1xf32, #tpu.memory_space<vmem>>, %arg4: memref<12x128xf32, #tpu.memory_space<vmem>>) attributes {dimension_semantics = [#tpu.dimension_semantics<parallel>], iteration_bounds = array<i64: 1>, scalar_prefetch = 0 : i64, scratch_operands = 0 : i64, tpu.core_type = #tpu.core_type<tc>, window_params = [{pipeline_mode = #tpu.pipeline_mode<synchronous>, transform_indices = @transform_0, window_bounds = array<i64: 12, 45>}, {transform_indices = @transform_1, window_bounds = array<i64: 45, 128>}, {pipeline_mode = #tpu.pipeline_mode<synchronous>, transform_indices = @transform_2, window_bounds = array<i64: 12, 1>}, {transform_indices = @transform_3, window_bounds = array<i64: 12, 128>}]} {
    %c0 = arith.constant 0 : index
    %c0_0 = arith.constant 0 : index
    %0 = vector.load %arg1[%c0, %c0_0] : memref<12x45xbf16, #tpu.memory_space<vmem>>, vector<12x45xbf16>
    %c0_1 = arith.constant 0 : index
    %c0_2 = arith.constant 0 : index
    %1 = vector.load %arg2[%c0_1, %c0_2] : memref<45x128xbf16, #tpu.memory_space<vmem>>, vector<45x128xbf16>
    %cst = arith.constant dense<0.000000e+00> : vector<12x128xf32>
    %2 = tpu.matmul %0, %1, %cst {dimension_numbers = #tpu.dot_dimension_numbers<[1], [0], [0], [1], [0, 0, 1, 1], [], []>} : vector<12x45xbf16>, vector<45x128xbf16>, vector<12x128xf32> -> vector<12x128xf32>
    %c0_3 = arith.constant 0 : index
    %c0_4 = arith.constant 0 : index
    %3 = vector.load %arg3[%c0_3, %c0_4] : memref<12x1xf32, #tpu.memory_space<vmem>>, vector<12x1xf32>
    %4 = vector.broadcast %3 : vector<12x1xf32> to vector<12x128xf32>
    %5 = arith.addf %2, %4 : vector<12x128xf32>
    %cst_5 = arith.constant 0.000000e+00 : f32
    %6 = vector.broadcast %cst_5 : f32 to vector<12x128xf32>
    %7 = arith.maximumf %5, %6 : vector<12x128xf32>
    %c0_6 = arith.constant 0 : index
    %c0_7 = arith.constant 0 : index
    %8 = vector.load %arg4[%c0_6, %c0_7] : memref<12x128xf32, #tpu.memory_space<vmem>>, vector<12x128xf32>
    tpu.vector_store %arg4[%c0_6, %c0_7], %7 {strides = array<i32>} : memref<12x128xf32, #tpu.memory_space<vmem>>, vector<12x128xf32>,
    return
  }
  func.func @transform_0(%arg0: i32) -> (i32, i32) {
    %c0_i32 = arith.constant 0 : i32
    %c0_i32_0 = arith.constant 0 : i32
    %c0_i32_1 = arith.constant 0 : i32
    return %c0_i32, %c0_i32_0 : i32, i32
  }
  func.func @transform_1(%arg0: i32) -> (i32, i32) {
    %c0_i32 = arith.constant 0 : i32
    %c0_i32_0 = arith.constant 0 : i32
    return %c0_i32, %arg0 : i32, i32
  }
  func.func @transform_2(%arg0: i32) -> (i32, i32) {
    %c0_i32 = arith.constant 0 : i32
    %c0_i32_0 = arith.constant 0 : i32
    %c0_i32_1 = arith.constant 0 : i32
    return %c0_i32, %c0_i32_0 : i32, i32
  }
  func.func @transform_3(%arg0: i32) -> (i32, i32) {
    %c0_i32 = arith.constant 0 : i32
    %c0_i32_0 = arith.constant 0 : i32
    return %c0_i32, %arg0 : i32, i32
  }
}

</mosaic_0001>

<bundles_post_ra>
// kernel: baseline_forward.6
= control target key start
LH: loop header
LB: loop body
LE: loop exit
PB: predicated region body
PF: predicated region fallthrough
CT: control target
= control target key end

     0   :  { %vm46_vm0 = vcmask 1044480   ;;  %vm47_vm1 = vcmask 1045504   ;;  %v162_v0 = vmov 0.0   ;;  %v163_v2 = vmov 65535   ;;  %s226_s1 = inlined_call_operand.vmem [shape: bf16[27,128], index: 1, kind: input, shape index: {}]   ;;  %s227_s3 = inlined_call_operand.vmem [shape: f32[4,1], index: 3, kind: input, shape index: {}]   ;;  %s228_s0 = inlined_call_operand.vmem [shape: bf16[4,27], index: 0, kind: input, shape index: {}]   ;;  %s229_s2 = inlined_call_operand.vmem [shape: f32[4,3,128], index: 2, kind: input, shape index: {}]   ;;  %s230_s5 = inlined_call_operand.vmem [shape: f32[1,128], index: 5, kind: output, shape index: {1}]   ;;  %s231_s4 = inlined_call_operand.vmem [shape: bf16[4,128], index: 4, kind: output, shape index: {0}]  }
   0x1   :  { %147 = vmatprep.subr.bf16.mxu0 %v162_v0  ;;  %v160_v1 = vld [vmem:[%s226_s1] sm:$0xff]   ;;  %v48_v3 = vsel %vm46_vm0, 4294967295, %v163_v2  ;;  %v161_v4 = vld [vmem:[%s226_s1 + $0x8] sm:$0x3f]   ;;  %vm164_vm2 = vmmov 0   ;;  %v165_v8 = vmov 0  }
   0x2   :  { %148 = vmatpush3.bf16.msra.mxu0 %v160_v1  ;;  %v49_v5 = vsel %vm47_vm1, %v48_v3, 0  ;;  %151 = vmatprep.mubr.msk.bf16.mxu0 %vm164_vm2, %v162_v0  ;;  %v25_v7 = vld [vmem:[%s227_s3] sm:$0xf]  ;;  %vm42_vm3 = vcmask 220160   ;;  %v141_v11 = vld [vmem:[%s229_s2 + $0x4] sm:$0x7] }
   0x3   :  { %149 = vmatprep.subr.bf16.mxu0 %v162_v0  ;;  %v51_v6 = vand.u32 %v161_v4, %v49_v5  ;;  %159 = vset.pattern.permute.xlu0 %v165_v8  ;;  %v20_v9 = vld [vmem:[%s228_s0] sm:$0x3]  ;;  %v142_v14 = vld [vmem:[%s229_s2 + $0x8] sm:$0x7]  ;;  %v143_v17 = vld [vmem:[%s229_s2 + $0xc] sm:$0x7] }
   0x4   :  { %28 = vperm.xlu0 %159, %v25_v7   ;;  %v96_v10 = vld [vmem:[%s229_s2] sm:$0x7]  ;;  %vm119_vm4 = vcmask 1042432  }
   0x5   :  { %v103_v12 = vsub.f32 %v96_v10, %v141_v11  ;;  %v107_v13 = vadd.f32 %v141_v11, %v96_v10 }
   0x6   :  { %150 = vmatpush3.bf16.msra.mxu0 %v51_v6 }
   0x7   :  { %v104_v15 = vadd.f32 %v142_v14, %v103_v12  ;;  %v108_v16 = vsub.f32 %v107_v13, %v142_v14  ;;  %v111_v20 = vsub.f32 %v103_v12, %v142_v14 }
   0x9   :  { %152 = vmatmul.mubr.msk.bf16.vlgmr.msra.gmra.mrb[0].mxu0 %vm42_vm3, %v20_v9  ;;  %v105_v18 = vsub.f32 %v104_v15, %v143_v17  ;;  %v109_v19 = vsub.f32 %v108_v16, %v143_v17  ;;  %v112_v23 = vadd.f32 %v143_v17, %v111_v20 }
   0xb   :  { %v106_v21 = vmul.f32 0.5, %v105_v18  ;;  %v110_v22 = vmul.f32 0.5, %v109_v19  ;;  %v113_v24 = vmul.f32 0.5, %v112_v23 }
   0xd   :  { %v114_v25 = vand.u32 2147483647, %v106_v21  ;;  %v115_v26 = vand.u32 2147483647, %v110_v22  ;;  %v117_v28 = vand.u32 2147483647, %v113_v24 }
   0xf   :  { %v116_v27 = vadd.f32 %v115_v26, %v114_v25 }
  0x11   :  { %v118_v29 = vadd.f32 %v117_v28, %v116_v27 }
  0x13   :  { %v120_v30 = vsel %vm119_vm4, %v118_v29, 0.0 }
  0x14   :  { %v121_v31 = vrot.slane %v120_v30, 4 }
  0x16   :  { %v122_v32 = vadd.f32 %v121_v31, %v120_v30 }
  0x18   :  { %v123_v33 = vrot.slane %v122_v32, 2 }
  0x1a   :  { %v124_v34 = vadd.f32 %v123_v33, %v122_v32 }
  0x1c   :  { %v125_v35 = vrot.slane %v124_v34, 1 }
  0x1e   :  { %v126_v36 = vadd.f32 %v125_v35, %v124_v34 }
  0x20   :  { %v128_v37 = vmul.f32 0.33333334, %v126_v36 }
  0x22   :  { %129 = vst [vmem:[%s230_s5] sm:$0x1] %v128_v37 }
  0x83   :  { %v29_v38 = vpop.permute.xlu0 %28 }
  0xdc   :  { %v87_v39 = vpop.f32.mrb[0].mxu0 }
  0xdd   :  { %v88_v40 = vadd.f32 %v87_v39, %v29_v38  ;;  %v153_v41 = vpop.f32.mrb[1].mxu0 }
  0xde   :  { %v90_v42 = vpop.f32.mrb[2].mxu0 }
  0xdf   :  { %v93_v43 = vmax.f32 %v88_v40, 0.0  ;;  %v154_v44 = vpop.f32.mrb[3].mxu0 }
  0xe1   :  { %v94_v45 = vpack.c.bf16 %v93_v43, %v93_v43 }
  0xe3   :  { %95 = vst [vmem:[%s231_s4] sm:$0x3] %v94_v45 }

// kernel: baseline_forward.7
= control target key start
LH: loop header
LB: loop body
LE: loop exit
PB: predicated region body
PF: predicated region fallthrough
CT: control target
= control target key end

     0   :  { %v155_v0 = vmov 0.0   ;;  %vm156_vm0 = vmmov 0   ;;  %v157_v2 = vmov 0   ;;  %vm58_vm1 = vcmask 1041408   ;;  %s199_s1 = inlined_call_operand.vmem [shape: bf16[36,128], index: 1, kind: input, shape index: {}]   ;;  %s200_s2 = inlined_call_operand.vmem [shape: f32[16,1], index: 2, kind: input, shape index: {}]   ;;  %s201_s0 = inlined_call_operand.vmem [shape: bf16[16,36], index: 0, kind: input, shape index: {}]   ;;  %s202_s3 = inlined_call_operand.vmem [shape: bf16[16,128], index: 3, kind: output, shape index: {}]  }
   0x1   :  { %137 = vmatprep.subr.bf16.mxu0 %v155_v0  ;;  %v151_v1 = vld [vmem:[%s199_s1] sm:$0xff]   ;;  %143 = vmatprep.mubr.msk.bf16.mxu0 %vm156_vm0, %v155_v0  ;;  %v152_v3 = vld [vmem:[%s199_s1 + $0x8] sm:$0xff]   ;;  %v153_v4 = vld [vmem:[%s199_s1 + $0x10] ss:$0 sps:$4 sm:$0x33]   ;;  %vm54_vm2 = vcmask 293888  }
   0x2   :  { %150 = vset.pattern.permute.xlu0 %v157_v2  ;;  %138 = vmatpush3.bf16.msra.mxu0 %v151_v1  ;;  %v22_v5 = vld [vmem:[%s200_s2] sm:$0xff]  ;;  %v23_v6 = vld [vmem:[%s200_s2 + $0x8] sm:$0xff]  ;;  %v60_v7 = vsel %vm58_vm1, %v153_v4, 0 }
   0x3   :  { %139 = vmatprep.subr.bf16.mxu0 %v155_v0  ;;  %26 = vperm.xlu0 %150, %v22_v5   ;;  %v154_v8 = vld [vmem:[%s201_s0] sm:$0xff]  }
   0x6   :  { %140 = vmatpush3.bf16.msra.mxu0 %v152_v3 }
   0x7   :  { %141 = vmatprep.subr.bf16.mxu0 %v155_v0  ;;  %31 = vperm.xlu0 %150, %v23_v6  }
   0xa   :  { %142 = vmatpush3.bf16.msra.mxu0 %v60_v7 }
   0xd   :  { %144 = vmatmul.mubr.msk.bf16.vlgmr.msra.gmra.mrb[0].mxu0 %vm54_vm2, %v154_v8 }
  0x82   :  { %v27_v9 = vpop.permute.xlu0 %26 }
  0x86   :  { %v32_v13 = vpop.permute.xlu0 %31 }
  0xe0   :  { %v96_v10 = vpop.f32.mrb[0].mxu0 }
  0xe1   :  { %v97_v11 = vadd.f32 %v96_v10, %v27_v9  ;;  %v145_v12 = vpop.f32.mrb[1].mxu0 }
  0xe2   :  { %v99_v14 = vpop.f32.mrb[2].mxu0 }
  0xe3   :  { %v100_v15 = vadd.f32 %v99_v14, %v32_v13  ;;  %v146_v16 = vpop.f32.mrb[3].mxu0  ;;  %v103_v17 = vmax.f32 %v97_v11, 0.0 }
  0xe5   :  { %v104_v18 = vmax.f32 %v100_v15, 0.0 }
  0xe7   :  { %v131_v19 = vpack.c.bf16 %v104_v18, %v103_v17 }
  0xe9   :  { %132 = vst [vmem:[%s202_s3] sm:$0xff] %v131_v19  }

// kernel: baseline_forward.8
= control target key start
LH: loop header
LB: loop body
LE: loop exit
PB: predicated region body
PF: predicated region fallthrough
CT: control target
= control target key end

     0   :  { %v287_v0 = vmov 0   ;;  %vm133_vm0 = vcmask 130048   ;;  %s365_s1 = inlined_call_operand.vmem [shape: bf16[144,128], index: 1, kind: input, shape index: {}]   ;;  %s366_s0 = inlined_call_operand.vmem [shape: bf16[32,144], index: 0, kind: input, shape index: {}]   ;;  %s367_s2 = inlined_call_operand.vmem [shape: f32[32,1], index: 2, kind: input, shape index: {}]   ;;  %s368_s3 = inlined_call_operand.vmem [shape: bf16[32,128], index: 3, kind: output, shape index: {}]  }
   0x1   :  { %140 = vmatprep.subr.bf16.mxu0 %v287_v0  ;;  %251 = vmatprep.subr.bf16.mxu1 %v287_v0  ;;  %v272_v1 = vld [vmem:[%s365_s1] sm:$0xff]   ;;  %v273_v2 = vld [vmem:[%s365_s1 + $0x8] sm:$0xff]   ;;  %v274_v3 = vld [vmem:[%s365_s1 + $0x10] sm:$0xff]  }
   0x2   :  { %271 = vset.pattern.permute.xlu1 %v287_v0  ;;  %270 = vset.pattern.permute.xlu0 %v287_v0  ;;  %v275_v4 = vld [vmem:[%s365_s1 + $0x18] sm:$0xff]   ;;  %v283_v5 = vld [vmem:[%s366_s0 + $0x4] ss:$8 sps:$4 sm:$0xff]   ;;  %v39_v7 = vld [vmem:[%s367_s2 + $0x10] sm:$0xff] }
   0x3   :  { %141 = vmatpush1.bf16.msra.mxu0 %v272_v1  ;;  %260 = vmatpush1.bf16.msra.mxu1 %v272_v1  ;;  %v286_v6 = vld [vmem:[%s366_s0 + $0x14] ss:$8 sps:$4 sm:$0xff]   ;;  %v37_v8 = vld [vmem:[%s367_s2] sm:$0xff]  ;;  %v38_v11 = vld [vmem:[%s367_s2 + $0x8] sm:$0xff] }
   0x4   :  { %142 = vmatprep.subr.bf16.mxu0 %v287_v0  ;;  %252 = vmatprep.subr.bf16.mxu1 %v287_v0  ;;  %v40_v9 = vld [vmem:[%s367_s2 + $0x18] sm:$0xff]  ;;  %v276_v10 = vld [vmem:[%s365_s1 + $0x20] sm:$0xff]   ;;  %v277_v12 = vld [vmem:[%s365_s1 + $0x28] sm:$0xff]  }
   0x5   :  { %230 = vmatprep.mubr.msk.bf16.mxu0 %vm133_vm0, %v283_v5  ;;  %53 = vperm.xlu1 %271, %v39_v7   ;;  %v278_v13 = vld [vmem:[%s365_s1 + $0x30] sm:$0xff]   ;;  %v279_v14 = vld [vmem:[%s365_s1 + $0x38] sm:$0xff]   ;;  %v280_v15 = vld [vmem:[%s365_s1 + $0x40] sm:$0xff]  }
   0x6   :  { %231 = vmatprep.mubr.msk.bf16.mxu1 %vm133_vm0, %v286_v6  ;;  %43 = vperm.xlu0 %270, %v37_v8   ;;  %v281_v16 = vld [vmem:[%s366_s0] ss:$8 sps:$4 sm:$0xff]   ;;  %v284_v17 = vld [vmem:[%s366_s0 + $0x10] ss:$8 sps:$4 sm:$0xff]  }
   0x7   :  { %143 = vmatpush1.bf16.msra.mxu0 %v273_v2  ;;  %261 = vmatpush1.bf16.msra.mxu1 %v273_v2 }
   0x8   :  { %144 = vmatprep.subr.bf16.mxu0 %v287_v0  ;;  %253 = vmatprep.subr.bf16.mxu1 %v287_v0 }
   0x9   :  { %58 = vperm.xlu1 %271, %v40_v9  }
   0xa   :  { %48 = vperm.xlu0 %270, %v38_v11  }
   0xb   :  { %145 = vmatpush1.bf16.msra.mxu0 %v274_v3  ;;  %262 = vmatpush1.bf16.msra.mxu1 %v274_v3 }
   0xc   :  { %146 = vmatprep.subr.bf16.mxu0 %v287_v0  ;;  %254 = vmatprep.subr.bf16.mxu1 %v287_v0 }
   0xf   :  { %147 = vmatpush1.bf16.msra.mxu0 %v275_v4  ;;  %263 = vmatpush1.bf16.msra.mxu1 %v275_v4 }
  0x10   :  { %148 = vmatprep.subr.bf16.mxu0 %v287_v0  ;;  %255 = vmatprep.subr.bf16.mxu1 %v287_v0 }
  0x13   :  { %149 = vmatpush1.bf16.msra.mxu0 %v276_v10  ;;  %264 = vmatpush1.bf16.msra.mxu1 %v276_v10 }
  0x14   :  { %150 = vmatprep.subr.bf16.mxu0 %v287_v0  ;;  %256 = vmatprep.subr.bf16.mxu1 %v287_v0 }
  0x17   :  { %151 = vmatpush1.bf16.msra.mxu0 %v277_v12  ;;  %265 = vmatpush1.bf16.msra.mxu1 %v277_v12 }
  0x18   :  { %152 = vmatprep.subr.bf16.mxu0 %v287_v0  ;;  %257 = vmatprep.subr.bf16.mxu1 %v287_v0 }
  0x1b   :  { %153 = vmatpush1.bf16.msra.mxu0 %v278_v13  ;;  %266 = vmatpush1.bf16.msra.mxu1 %v278_v13 }
  0x1c   :  { %154 = vmatprep.subr.bf16.mxu0 %v287_v0  ;;  %258 = vmatprep.subr.bf16.mxu1 %v287_v0 }
  0x1f   :  { %155 = vmatpush1.bf16.msra.mxu0 %v279_v14  ;;  %267 = vmatpush1.bf16.msra.mxu1 %v279_v14 }
  0x20   :  { %156 = vmatprep.subr.bf16.mxu0 %v287_v0  ;;  %259 = vmatprep.subr.bf16.mxu1 %v287_v0 }
  0x23   :  { %157 = vmatpush1.bf16.msra.mxu0 %v280_v15  ;;  %268 = vmatpush1.bf16.msra.mxu1 %v280_v15 }
  0x26   :  { %173 = vmatmul.mubr.bf16.vlgmr.msra.gmra.mrb[0].mxu0 %v281_v16  ;;  %181 = vmatmul.mubr.bf16.vlgmr.msra.gmra.mrb[0].mxu1 %v284_v17 }
  0x84   :  { %v54_v18 = vpop.permute.xlu1 %53 }
  0x85   :  { %v44_v19 = vpop.permute.xlu0 %43 }
  0x88   :  { %v59_v20 = vpop.permute.xlu1 %58 }
  0x89   :  { %v49_v21 = vpop.permute.xlu0 %48 }
  0xf9   :  { %v174_v22 = vpop.f32.mrb[0].mxu0  ;;  %v182_v23 = vpop.f32.mrb[0].mxu1 }
  0xfa   :  { %v175_v24 = vadd.f32 %v174_v22, %v44_v19  ;;  %v183_v25 = vadd.f32 %v182_v23, %v54_v18  ;;  %v176_v26 = vpop.f32.mrb[1].mxu0  ;;  %v184_v27 = vpop.f32.mrb[1].mxu1 }
  0xfb   :  { %v177_v28 = vpop.f32.mrb[2].mxu0  ;;  %v185_v29 = vpop.f32.mrb[2].mxu1 }
  0xfc   :  { %v178_v30 = vadd.f32 %v177_v28, %v49_v21  ;;  %v186_v31 = vadd.f32 %v185_v29, %v59_v20  ;;  %v179_v32 = vpop.f32.mrb[3].mxu0  ;;  %v187_v33 = vpop.f32.mrb[3].mxu1  ;;  %v189_v34 = vmax.f32 %v175_v24, 0.0  ;;  %v191_v35 = vmax.f32 %v183_v25, 0.0 }
  0xfe   :  { %v190_v36 = vmax.f32 %v178_v30, 0.0  ;;  %v192_v37 = vmax.f32 %v186_v31, 0.0 }
 0x100   :  { %v243_v38 = vpack.c.bf16 %v190_v36, %v189_v34  ;;  %v248_v39 = vpack.c.bf16 %v192_v37, %v191_v35 }
 0x102   :  { %244 = vst [vmem:[%s368_s3] sm:$0xff] %v243_v38   ;;  %250 = vst [vmem:[%s368_s3 + $0x8] sm:$0xff] %v248_v39  }

// kernel: tile.14
= control target key start
LH: loop header
LB: loop body
LE: loop exit
PB: predicated region body
PF: predicated region fallthrough
CT: control target
= control target key end

     0   :  { %s22_s0 = inlined_call_operand.vmem [shape: f32[16], index: 0, kind: input, shape index: {}]   ;;  %s23_s1 = inlined_call_operand.vmem [shape: f32[4,1,1,16], index: 1, kind: output, shape index: {}]  }
   0x1   :  { %v4_v0 = vld [vmem:[%s22_s0] ss:$0 sm:$0xff] }
   0x2   :  { %5 = vst [vmem:[%s23_s1] sm:$0xf] %v4_v0 }

// kernel: tile.0
= control target key start
LH: loop header
LB: loop body
LE: loop exit
PB: predicated region body
PF: predicated region fallthrough
CT: control target
= control target key end

     0   :  { %s176_s8 = smov 125   ;;  %s177_s9 = smov 126   ;;  %vm7_vm0 = vcmask 7168   ;;  %s331_s0 = inlined_call_operand.vmem [shape: f32[4,1,1,16], index: 0, kind: input, shape index: {}]   ;;  %s332_s1 = inlined_call_operand.vmem [shape: f32[64,1], index: 1, kind: output, shape index: {}]  }
   0x1   :  { %v4_v0 = vld [vmem:[%s331_s0] sm:$0xf]  ;;  %s175_s0 = smov 127   ;;  %s178_s10 = smov 124  }
   0x2   :  { %5 = vst [vmem:[#allocation0] sm:$0xf] %v4_v0  ;;  %s179_s11 = smov 123   ;;  %s180_s12 = smov 122  }
   0x3   :  { %s181_s13 = smov 121   ;;  %s182_s14 = smov 120  }
   0x4   :  { %s183_s19 = smov 119   ;;  %s184_s20 = smov 118  }
   0x5   :  { %s185_s21 = smov 117   ;;  %s186_s22 = smov 116  }
   0x6   :  { %s187_s23 = smov 115   ;;  %s188_s24 = smov 114  }
   0x7   :  { %s189_s25 = smov 113  }
   0x9   :  { %v10_v1 = vld [vmem:[#allocation0] sm:$0xf]  }
   0xa   :  { %v26_v2 = vld [vmem:[#allocation0] sm:$0xf]   ;;  %11 = vrot.lane.b32.xlu0 %v10_v1, %s175_s0 }
   0xb   :  { %27 = vrot.lane.b32.xlu1 %v26_v2, %s176_s8  ;;  %v18_v3 = vld [vmem:[#allocation0] sm:$0xf]  }
   0xc   :  { %v34_v4 = vld [vmem:[#allocation0] sm:$0xf]  }
   0xd   :  { %v42_v5 = vld [vmem:[#allocation0] sm:$0xf]  }
   0xe   :  { %19 = vrot.lane.b32.xlu0 %v18_v3, %s177_s9  ;;  %v50_v6 = vld [vmem:[#allocation0] sm:$0xf]  }
   0xf   :  { %35 = vrot.lane.b32.xlu1 %v34_v4, %s178_s10  ;;  %v58_v7 = vld [vmem:[#allocation0] sm:$0xf]  }
  0x10   :  { %v66_v8 = vld [vmem:[#allocation0] sm:$0xf]  }
  0x11   :  { %v74_v9 = vld [vmem:[#allocation0] sm:$0xf]  }
  0x12   :  { %43 = vrot.lane.b32.xlu0 %v42_v5, %s179_s11  ;;  %v82_v10 = vld [vmem:[#allocation0] sm:$0xf]  }
  0x13   :  { %51 = vrot.lane.b32.xlu1 %v50_v6, %s180_s12  ;;  %v6_v11 = vld [vmem:[#allocation0] sm:$0xf]  }
  0x14   :  { %8 = vst.msk [vmem:[%s332_s1] ss:$16 sm:$0x3] %vm7_vm0, %v6_v11   ;;  %9 = vst.msk [vmem:[%s332_s1] ss:$16 sm:$0xc] %vm7_vm0, %v6_v11  }
  0x15   :  { %v90_v12 = vld [vmem:[#allocation0] sm:$0xf]  }
  0x16   :  { %59 = vrot.lane.b32.xlu0 %v58_v7, %s181_s13  ;;  %v98_v13 = vld [vmem:[#allocation0] sm:$0xf]  }
  0x17   :  { %67 = vrot.lane.b32.xlu1 %v66_v8, %s182_s14  ;;  %v106_v14 = vld [vmem:[#allocation0] sm:$0xf]  }
  0x18   :  { %v114_v15 = vld [vmem:[#allocation0] sm:$0xf]  }
  0x19   :  { %v122_v16 = vld [vmem:[#allocation0] sm:$0xf]  }
  0x1a   :  { %75 = vrot.lane.b32.xlu0 %v74_v9, %s183_s19 }
  0x1b   :  { %83 = vrot.lane.b32.xlu1 %v82_v10, %s184_s20 }
  0x1e   :  { %91 = vrot.lane.b32.xlu0 %v90_v12, %s185_s21 }
  0x1f   :  { %99 = vrot.lane.b32.xlu1 %v98_v13, %s186_s22 }
  0x22   :  { %107 = vrot.lane.b32.xlu0 %v106_v14, %s187_s23 }
  0x23   :  { %115 = vrot.lane.b32.xlu1 %v114_v15, %s188_s24 }
  0x26   :  { %123 = vrot.lane.b32.xlu0 %v122_v16, %s189_s25 }
  0x7c   :  { %v12_v17 = vpop.permute.xlu0 %11  }
  0x7d   :  { %v28_v18 = vpop.permute.xlu1 %27   ;;  %130 = vst.msk [vmem:[%s332_s1 + $0x1] ss:$16 sm:$0x3] %vm7_vm0, %v12_v17   ;;  %131 = vst.msk [vmem:[%s332_s1 + $0x1] ss:$16 sm:$0xc] %vm7_vm0, %v12_v17  }
  0x7e   :  { %134 = vst.msk [vmem:[%s332_s1 + $0x3] ss:$16 sm:$0x3] %vm7_vm0, %v28_v18   ;;  %135 = vst.msk [vmem:[%s332_s1 + $0x3] ss:$16 sm:$0xc] %vm7_vm0, %v28_v18  }
  0x80   :  { %v20_v19 = vpop.permute.xlu0 %19  }
  0x81   :  { %v36_v20 = vpop.permute.xlu1 %35   ;;  %132 = vst.msk [vmem:[%s332_s1 + $0x2] ss:$16 sm:$0x3] %vm7_vm0, %v20_v19   ;;  %133 = vst.msk [vmem:[%s332_s1 + $0x2] ss:$16 sm:$0xc] %vm7_vm0, %v20_v19  }
  0x82   :  { %136 = vst.msk [vmem:[%s332_s1 + $0x4] ss:$16 sm:$0x3] %vm7_vm0, %v36_v20   ;;  %137 = vst.msk [vmem:[%s332_s1 + $0x4] ss:$16 sm:$0xc] %vm7_vm0, %v36_v20  }
  0x84   :  { %v44_v21 = vpop.permute.xlu0 %43  }
  0x85   :  { %v52_v22 = vpop.permute.xlu1 %51   ;;  %138 = vst.msk [vmem:[%s332_s1 + $0x5] ss:$16 sm:$0x3] %vm7_vm0, %v44_v21   ;;  %139 = vst.msk [vmem:[%s332_s1 + $0x5] ss:$16 sm:$0xc] %vm7_vm0, %v44_v21  }
  0x86   :  { %140 = vst.msk [vmem:[%s332_s1 + $0x6] ss:$16 sm:$0x3] %vm7_vm0, %v52_v22   ;;  %141 = vst.msk [vmem:[%s332_s1 + $0x6] ss:$16 sm:$0xc] %vm7_vm0, %v52_v22  }
  0x88   :  { %v60_v23 = vpop.permute.xlu0 %59  }
  0x89   :  { %v68_v24 = vpop.permute.xlu1 %67   ;;  %142 = vst.msk [vmem:[%s332_s1 + $0x7] ss:$16 sm:$0x3] %vm7_vm0, %v60_v23   ;;  %143 = vst.msk [vmem:[%s332_s1 + $0x7] ss:$16 sm:$0xc] %vm7_vm0, %v60_v23  }
  0x8a   :  { %144 = vst.msk [vmem:[%s332_s1 + $0x8] ss:$16 sm:$0x3] %vm7_vm0, %v68_v24   ;;  %145 = vst.msk [vmem:[%s332_s1 + $0x8] ss:$16 sm:$0xc] %vm7_vm0, %v68_v24  }
  0x8c   :  { %v76_v25 = vpop.permute.xlu0 %75  }
  0x8d   :  { %v84_v26 = vpop.permute.xlu1 %83   ;;  %146 = vst.msk [vmem:[%s332_s1 + $0x9] ss:$16 sm:$0x3] %vm7_vm0, %v76_v25   ;;  %147 = vst.msk [vmem:[%s332_s1 + $0x9] ss:$16 sm:$0xc] %vm7_vm0, %v76_v25  }
  0x8e   :  { %148 = vst.msk [vmem:[%s332_s1 + $0xa] ss:$16 sm:$0x3] %vm7_vm0, %v84_v26   ;;  %149 = vst.msk [vmem:[%s332_s1 + $0xa] ss:$16 sm:$0xc] %vm7_vm0, %v84_v26  }
  0x90   :  { %v92_v27 = vpop.permute.xlu0 %91  }
  0x91   :  { %v100_v28 = vpop.permute.xlu1 %99   ;;  %150 = vst.msk [vmem:[%s332_s1 + $0xb] ss:$16 sm:$0x3] %vm7_vm0, %v92_v27   ;;  %151 = vst.msk [vmem:[%s332_s1 + $0xb] ss:$16 sm:$0xc] %vm7_vm0, %v92_v27  }
  0x92   :  { %152 = vst.msk [vmem:[%s332_s1 + $0xc] ss:$16 sm:$0x3] %vm7_vm0, %v100_v28   ;;  %153 = vst.msk [vmem:[%s332_s1 + $0xc] ss:$16 sm:$0xc] %vm7_vm0, %v100_v28  }
  0x94   :  { %v108_v29 = vpop.permute.xlu0 %107  }
  0x95   :  { %v116_v30 = vpop.permute.xlu1 %115   ;;  %154 = vst.msk [vmem:[%s332_s1 + $0xd] ss:$16 sm:$0x3] %vm7_vm0, %v108_v29   ;;  %155 = vst.msk [vmem:[%s332_s1 + $0xd] ss:$16 sm:$0xc] %vm7_vm0, %v108_v29  }
  0x96   :  { %156 = vst.msk [vmem:[%s332_s1 + $0xe] ss:$16 sm:$0x3] %vm7_vm0, %v116_v30   ;;  %157 = vst.msk [vmem:[%s332_s1 + $0xe] ss:$16 sm:$0xc] %vm7_vm0, %v116_v30  }
  0x98   :  { %v124_v31 = vpop.permute.xlu0 %123  }
  0x99   :  { %158 = vst.msk [vmem:[%s332_s1 + $0xf] ss:$16 sm:$0x3] %vm7_vm0, %v124_v31   ;;  %159 = vst.msk [vmem:[%s332_s1 + $0xf] ss:$16 sm:$0xc] %vm7_vm0, %v124_v31  }

// kernel: baseline_forward.9
= control target key start
LH: loop header
LB: loop body
LE: loop exit
PB: predicated region body
PF: predicated region fallthrough
CT: control target
= control target key end

     0   :  { %v662_v1 = vmov 0   ;;  %vm283_vm0 = vcmask 261120   ;;  %s813_s1 = inlined_call_operand.vmem [shape: bf16[288,128], index: 1, kind: input, shape index: {}]   ;;  %s814_s0 = inlined_call_operand.vmem [shape: bf16[64,288], index: 0, kind: input, shape index: {}]   ;;  %s815_s2 = inlined_call_operand.vmem [shape: f32[64,1], index: 2, kind: input, shape index: {}]   ;;  %s816_s3 = inlined_call_operand.vmem [shape: bf16[64,128], index: 3, kind: output, shape index: {}]  }
   0x1   :  { %v628_v0 = vld [vmem:[%s813_s1 + $0x40] sm:$0xff]   ;;  %627 = vset.pattern.permute.xlu1 %v662_v1  ;;  %626 = vset.pattern.permute.xlu0 %v662_v1  ;;  %v630_v3 = vld [vmem:[%s813_s1 + $0x48] sm:$0xff]   ;;  %v632_v5 = vld [vmem:[%s813_s1 + $0x50] sm:$0xff]  }
   0x2   :  { %v629_v2 = vld [vmem:[%s813_s1] sm:$0xff]   ;;  %551 = vmatprep.subr.bf16.mxu0 %v628_v0  ;;  %609 = vmatprep.subr.bf16.mxu1 %v628_v0  ;;  %v631_v4 = vld [vmem:[%s813_s1 + $0x8] sm:$0xff]   ;;  %v633_v6 = vld [vmem:[%s813_s1 + $0x10] sm:$0xff]  }
   0x3   :  { %552 = vmatpush3.bf16.msra.mxu0 %v629_v2  ;;  %617 = vmatpush3.bf16.msra.mxu1 %v629_v2  ;;  %v634_v7 = vld [vmem:[%s813_s1 + $0x58] sm:$0xff]   ;;  %v636_v9 = vld [vmem:[%s813_s1 + $0x60] sm:$0xff]   ;;  %v638_v11 = vld [vmem:[%s813_s1 + $0x68] sm:$0xff]  }
   0x4   :  { %553 = vmatprep.subr.bf16.mxu0 %v630_v3  ;;  %610 = vmatprep.subr.bf16.mxu1 %v630_v3  ;;  %v635_v8 = vld [vmem:[%s813_s1 + $0x18] sm:$0xff]   ;;  %v637_v10 = vld [vmem:[%s813_s1 + $0x20] sm:$0xff]   ;;  %v639_v14 = vld [vmem:[%s813_s1 + $0x28] sm:$0xff]  }
   0x5   :  { %v646_v12 = vld [vmem:[%s814_s0 + $0x4] ss:$12 sps:$4 sm:$0xff]   ;;  %v649_v13 = vld [vmem:[%s814_s0 + $0x4c] ss:$12 sps:$4 sm:$0xff]   ;;  %v647_v23 = vld [vmem:[%s814_s0 + $0x48] ss:$12 sps:$4 sm:$0xff]  }
   0x6   :  { %v640_v15 = vld [vmem:[%s813_s1 + $0x70] sm:$0xff]   ;;  %328 = vmatprep.mubr.bf16.mxu0 %v646_v12  ;;  %352 = vmatprep.mubr.bf16.mxu1 %v649_v13  ;;  %v642_v17 = vld [vmem:[%s813_s1 + $0x78] sm:$0xff]   ;;  %v67_v20 = vld [vmem:[%s815_s2] sm:$0xff] }
   0x7   :  { %554 = vmatpush3.bf16.msra.mxu0 %v631_v4  ;;  %618 = vmatpush3.bf16.msra.mxu1 %v631_v4  ;;  %v641_v16 = vld [vmem:[%s813_s1 + $0x30] sm:$0xff]   ;;  %v643_v18 = vld [vmem:[%s813_s1 + $0x38] sm:$0xff]   ;;  %v650_v21 = vld [vmem:[%s813_s1 + $0x80] sm:$0xff]  }
   0x8   :  { %555 = vmatprep.subr.bf16.mxu0 %v632_v5  ;;  %611 = vmatprep.subr.bf16.mxu1 %v632_v5  ;;  %v69_v19 = vld [vmem:[%s815_s2 + $0x10] sm:$0xff]  ;;  %v644_v22 = vld [vmem:[%s814_s0] ss:$12 sps:$4 sm:$0xff]   ;;  %v70_v24 = vld [vmem:[%s815_s2 + $0x18] sm:$0xff] }
   0x9   :  { %87 = vperm.xlu1 %627, %v69_v19   ;;  %77 = vperm.xlu0 %626, %v67_v20   ;;  %v68_v25 = vld [vmem:[%s815_s2 + $0x8] sm:$0xff]  ;;  %v71_v30 = vld [vmem:[%s815_s2 + $0x20] sm:$0xff]  ;;  %v74_v33 = vld [vmem:[%s815_s2 + $0x38] sm:$0xff] }
   0xa   :  { %v652_v26 = vld [vmem:[%s814_s0 + $0x1c] ss:$12 sps:$4 sm:$0xff]   ;;  %v655_v31 = vld [vmem:[%s814_s0 + $0x18] ss:$12 sps:$4 sm:$0xff]   ;;  %v656_v32 = vld [vmem:[%s814_s0 + $0x20] ss:$12 sps:$4 sm:$0xff]  }
   0xb   :  { %556 = vmatpush3.bf16.msra.mxu0 %v633_v6  ;;  %619 = vmatpush3.bf16.msra.mxu1 %v633_v6  ;;  %v651_v27 = vld [vmem:[%s813_s1 + $0x88] sm:$0xff]   ;;  %v73_v34 = vld [vmem:[%s815_s2 + $0x30] sm:$0xff]  ;;  %v659_v36 = vld [vmem:[%s814_s0 + $0x38] ss:$12 sps:$4 sm:$0xff]  }
   0xc   :  { %557 = vmatprep.subr.bf16.mxu0 %v634_v7  ;;  %612 = vmatprep.subr.bf16.mxu1 %v634_v7  ;;  %v654_v28 = vld [vmem:[%s814_s0 + $0x8] ss:$12 sps:$4 sm:$0xff]   ;;  %v660_v37 = vld [vmem:[%s814_s0 + $0x30] ss:$12 sps:$4 sm:$0xff]  }
   0xd   :  { %92 = vperm.xlu1 %627, %v70_v24   ;;  %82 = vperm.xlu0 %626, %v68_v25   ;;  %v72_v29 = vld [vmem:[%s815_s2 + $0x28] sm:$0xff]  ;;  %v657_v35 = vld [vmem:[%s814_s0 + $0x34] ss:$12 sps:$4 sm:$0xff]   ;;  %v661_v38 = vld [vmem:[%s814_s0 + $0x50] ss:$12 sps:$4 sm:$0xff]  }
   0xf   :  { %558 = vmatpush3.bf16.msra.mxu0 %v635_v8  ;;  %620 = vmatpush3.bf16.msra.mxu1 %v635_v8 }
  0x10   :  { %559 = vmatprep.subr.bf16.mxu0 %v636_v9  ;;  %613 = vmatprep.subr.bf16.mxu1 %v636_v9 }
  0x11   :  { %102 = vperm.xlu1 %627, %v72_v29   ;;  %97 = vperm.xlu0 %626, %v71_v30  }
  0x13   :  { %560 = vmatpush3.bf16.msra.mxu0 %v637_v10  ;;  %621 = vmatpush3.bf16.msra.mxu1 %v637_v10 }
  0x14   :  { %561 = vmatprep.subr.bf16.mxu0 %v638_v11  ;;  %614 = vmatprep.subr.bf16.mxu1 %v638_v11 }
  0x15   :  { %112 = vperm.xlu1 %627, %v74_v33   ;;  %107 = vperm.xlu0 %626, %v73_v34  }
  0x17   :  { %562 = vmatpush3.bf16.msra.mxu0 %v639_v14  ;;  %622 = vmatpush3.bf16.msra.mxu1 %v639_v14 }
  0x18   :  { %563 = vmatprep.subr.bf16.mxu0 %v640_v15  ;;  %615 = vmatprep.subr.bf16.mxu1 %v640_v15 }
  0x1b   :  { %564 = vmatpush3.bf16.msra.mxu0 %v641_v16  ;;  %623 = vmatpush3.bf16.msra.mxu1 %v641_v16 }
  0x1c   :  { %565 = vmatprep.subr.bf16.mxu0 %v642_v17  ;;  %616 = vmatprep.subr.bf16.mxu1 %v642_v17 }
  0x1f   :  { %566 = vmatpush3.bf16.msra.mxu0 %v643_v18  ;;  %624 = vmatpush3.bf16.msra.mxu1 %v643_v18 }
  0x20   :  { %597 = vmatprep.subr.bf16.mxu1 %v650_v21 }
  0x22   :  { %329 = vmatmul.mubr.bf16.vlgmr.msra.gmra.mrb[0].mxu0 %v644_v22  ;;  %353 = vmatmul.mubr.bf16.vlgmr.msra.gmra.mrb[0].mxu1 %v647_v23 }
  0x23   :  { %598 = vmatpush3.bf16.msra.mxu1 %v650_v21  ;;  %336 = vmatprep.mubr.bf16.mxu0 %v652_v26 }
  0x24   :  { %599 = vmatprep.subr.bf16.mxu1 %v651_v27  ;;  %601 = vmatprep.mubr.msk.bf16.mxu1 %vm283_vm0, %v654_v28 }
  0x27   :  { %600 = vmatpush3.bf16.msra.mxu1 %v651_v27 }
  0x2a   :  { %337 = vmatmul.mubr.bf16.gmra.mrb[4].mxu0 %v655_v31  ;;  %602 = vmatmul.mubr.msk.bf16.vlgmr.msra.gmra.mrb[4].mxu1 %vm283_vm0, %v656_v32 }
  0x2b   :  { %344 = vmatprep.mubr.bf16.mxu0 %v657_v35  ;;  %605 = vmatprep.mubr.msk.bf16.mxu1 %vm283_vm0, %v659_v36 }
  0x32   :  { %345 = vmatmul.mubr.bf16.gmra.mrb[8].mxu0 %v660_v37  ;;  %606 = vmatmul.mubr.msk.bf16.gmra.mrb[8].mxu1 %vm283_vm0, %v661_v38 }
  0x88   :  { %v88_v39 = vpop.permute.xlu1 %87  ;;  %v78_v40 = vpop.permute.xlu0 %77 }
  0x8c   :  { %v93_v41 = vpop.permute.xlu1 %92  ;;  %v83_v42 = vpop.permute.xlu0 %82 }
  0x90   :  { %v98_v55 = vpop.permute.xlu0 %97  ;;  %v103_v56 = vpop.permute.xlu1 %102 }
  0x94   :  { %v108_v5 = vpop.permute.xlu0 %107  ;;  %v113_v9 = vpop.permute.xlu1 %112 }
  0xf5   :  { %v567_v43 = vpop.f32.mrb[0].mxu0  ;;  %v585_v44 = vpop.f32.mrb[0].mxu1 }
  0xf6   :  { %v568_v45 = vpop.f32.mrb[1].mxu0  ;;  %v586_v46 = vpop.f32.mrb[1].mxu1 }
  0xf7   :  { %v569_v47 = vadd.f32 %v568_v45, %v567_v43  ;;  %v570_v48 = vpop.f32.mrb[2].mxu0  ;;  %v587_v49 = vadd.f32 %v586_v46, %v585_v44  ;;  %v588_v50 = vpop.f32.mrb[2].mxu1 }
  0xf8   :  { %v571_v51 = vpop.f32.mrb[3].mxu0  ;;  %v589_v52 = vpop.f32.mrb[3].mxu1 }
  0xf9   :  { %v572_v53 = vadd.f32 %v571_v51, %v570_v48  ;;  %v590_v54 = vadd.f32 %v589_v52, %v588_v50  ;;  %v331_v59 = vadd.f32 %v569_v47, %v78_v40  ;;  %v355_v14 = vadd.f32 %v587_v49, %v108_v5 }
  0xfb   :  { %v334_v2 = vadd.f32 %v572_v53, %v83_v42  ;;  %v358_v19 = vadd.f32 %v590_v54, %v113_v9 }
  0xfd   :  { %v573_v57 = vpop.f32.mrb[4].mxu0  ;;  %v603_v58 = vpop.f32.mrb[4].mxu1 }
  0xfe   :  { %v574_v60 = vpop.f32.mrb[5].mxu0  ;;  %v395_v61 = vpop.f32.mrb[5].mxu1 }
  0xff   :  { %v575_v62 = vadd.f32 %v574_v60, %v573_v57  ;;  %v396_v63 = vadd.f32 %v395_v61, %v331_v59  ;;  %v576_v0 = vpop.f32.mrb[6].mxu0  ;;  %v604_v1 = vpop.f32.mrb[6].mxu1 }
 0x100   :  { %v577_v3 = vpop.f32.mrb[7].mxu0  ;;  %v398_v4 = vpop.f32.mrb[7].mxu1 }
 0x101   :  { %v339_v6 = vadd.f32 %v575_v62, %v88_v39  ;;  %v578_v7 = vadd.f32 %v577_v3, %v576_v0  ;;  %v399_v8 = vadd.f32 %v398_v4, %v334_v2  ;;  %v426_v11 = vmax.f32 %v396_v63, 0.0 }
 0x103   :  { %v404_v10 = vadd.f32 %v603_v58, %v339_v6  ;;  %v342_v12 = vadd.f32 %v578_v7, %v93_v41  ;;  %v427_v13 = vmax.f32 %v399_v8, 0.0 }
 0x105   :  { %v407_v15 = vadd.f32 %v604_v1, %v342_v12  ;;  %v531_v16 = vpack.c.bf16 %v427_v13, %v426_v11  ;;  %v579_v17 = vpop.f32.mrb[8].mxu0  ;;  %v607_v18 = vpop.f32.mrb[8].mxu1  ;;  %v428_v23 = vmax.f32 %v404_v10, 0.0 }
 0x106   :  { %v420_v20 = vadd.f32 %v607_v18, %v355_v14  ;;  %v580_v21 = vpop.f32.mrb[9].mxu0  ;;  %v411_v22 = vpop.f32.mrb[9].mxu1 }
 0x107   :  { %v429_v24 = vmax.f32 %v407_v15, 0.0  ;;  %532 = vst [vmem:[%s816_s3] sm:$0xff] %v531_v16   ;;  %v581_v25 = vadd.f32 %v580_v21, %v579_v17  ;;  %v582_v26 = vpop.f32.mrb[10].mxu0  ;;  %v608_v27 = vpop.f32.mrb[10].mxu1 }
 0x108   :  { %v423_v28 = vadd.f32 %v608_v27, %v358_v19  ;;  %v583_v29 = vpop.f32.mrb[11].mxu0  ;;  %v414_v30 = vpop.f32.mrb[11].mxu1  ;;  %v432_v34 = vmax.f32 %v420_v20, 0.0 }
 0x109   :  { %v536_v31 = vpack.c.bf16 %v429_v24, %v428_v23  ;;  %v347_v32 = vadd.f32 %v581_v25, %v98_v55  ;;  %v584_v33 = vadd.f32 %v583_v29, %v582_v26 }
 0x10a   :  { %v433_v35 = vmax.f32 %v423_v28, 0.0 }
 0x10b   :  { %548 = vst [vmem:[%s816_s3 + $0x8] sm:$0xff] %v536_v31   ;;  %v412_v36 = vadd.f32 %v411_v22, %v347_v32  ;;  %v350_v37 = vadd.f32 %v584_v33, %v103_v56 }
 0x10c   :  { %v546_v38 = vpack.c.bf16 %v433_v35, %v432_v34 }
 0x10d   :  { %v415_v39 = vadd.f32 %v414_v30, %v350_v37  ;;  %v430_v40 = vmax.f32 %v412_v36, 0.0 }
 0x10e   :  { %550 = vst [vmem:[%s816_s3 + $0x18] sm:$0xff] %v546_v38  }
 0x10f   :  { %v431_v41 = vmax.f32 %v415_v39, 0.0 }
 0x111   :  { %v541_v42 = vpack.c.bf16 %v431_v41, %v430_v40 }
 0x113   :  { %549 = vst [vmem:[%s816_s3 + $0x10] sm:$0xff] %v541_v42  }

// kernel: tile.18
= control target key start
LH: loop header
LB: loop body
LE: loop exit
PB: predicated region body
PF: predicated region fallthrough
CT: control target
= control target key end

     0   :  { %s22_s0 = inlined_call_operand.vmem [shape: f32[4], index: 0, kind: input, shape index: {}]   ;;  %s23_s1 = inlined_call_operand.vmem [shape: f32[4,1,1,4], index: 1, kind: output, shape index: {}]  }
   0x1   :  { %v4_v0 = vld [vmem:[%s22_s0] ss:$0 sm:$0xff] }
   0x2   :  { %5 = vst [vmem:[%s23_s1] sm:$0xf] %v4_v0 }

// kernel: tile.1
= control target key start
LH: loop header
LB: loop body
LE: loop exit
PB: predicated region body
PF: predicated region fallthrough
CT: control target
= control target key end

     0   :  { %s34_s8 = smov 125   ;;  %vm7_vm0 = vcmask 7168   ;;  %s35_s11 = smov 126   ;;  %s61_s0 = inlined_call_operand.vmem [shape: f32[4,1,1,4], index: 0, kind: input, shape index: {}]   ;;  %s62_s1 = inlined_call_operand.vmem [shape: f32[16,1], index: 1, kind: output, shape index: {}]  }
   0x1   :  { %v4_v0 = vld [vmem:[%s61_s0] sm:$0xf]  ;;  %s33_s0 = smov 127  }
   0x2   :  { %5 = vst [vmem:[#allocation0] sm:$0xf] %v4_v0 }
   0x9   :  { %v9_v1 = vld [vmem:[#allocation0] sm:$0xf]  }
   0xa   :  { %v21_v2 = vld [vmem:[#allocation0] sm:$0xf]   ;;  %10 = vrot.lane.b32.xlu0 %v9_v1, %s33_s0 }
   0xb   :  { %22 = vrot.lane.b32.xlu1 %v21_v2, %s34_s8  ;;  %v6_v3 = vld [vmem:[#allocation0] sm:$0xf]  }
   0xc   :  { %v15_v4 = vld [vmem:[#allocation0] sm:$0xf]   ;;  %8 = vst.msk [vmem:[%s62_s1] ss:$4 sm:$0xf] %vm7_vm0, %v6_v3  }
   0xe   :  { %16 = vrot.lane.b32.xlu0 %v15_v4, %s35_s11 }
  0x7c   :  { %v11_v5 = vpop.permute.xlu0 %10  }
  0x7d   :  { %v23_v6 = vpop.permute.xlu1 %22   ;;  %27 = vst.msk [vmem:[%s62_s1 + $0x1] ss:$4 sm:$0xf] %vm7_vm0, %v11_v5  }
  0x7e   :  { %29 = vst.msk [vmem:[%s62_s1 + $0x3] ss:$4 sm:$0xf] %vm7_vm0, %v23_v6  }
  0x80   :  { %v17_v7 = vpop.permute.xlu0 %16  }
  0x81   :  { %28 = vst.msk [vmem:[%s62_s1 + $0x2] ss:$4 sm:$0xf] %vm7_vm0, %v17_v7  }

// kernel: baseline_forward.10
= control target key start
LH: loop header
LB: loop body
LE: loop exit
PB: predicated region body
PF: predicated region fallthrough
CT: control target
= control target key end

     0   :  { %v206_v0 = vmov 0   ;;  %vm110_vm0 = vcmask 130048   ;;  %s269_s1 = inlined_call_operand.vmem [shape: bf16[144,128], index: 1, kind: input, shape index: {}]   ;;  %s270_s0 = inlined_call_operand.vmem [shape: bf16[16,144], index: 0, kind: input, shape index: {}]   ;;  %s271_s2 = inlined_call_operand.vmem [shape: f32[16,1], index: 2, kind: input, shape index: {}]   ;;  %s272_s3 = inlined_call_operand.vmem [shape: bf16[16,128], index: 3, kind: output, shape index: {}]  }
   0x1   :  { %114 = vmatprep.subr.bf16.mxu0 %v206_v0  ;;  %v194_v1 = vld [vmem:[%s269_s1] sm:$0xff]   ;;  %193 = vset.pattern.permute.xlu0 %v206_v0  ;;  %v195_v2 = vld [vmem:[%s269_s1 + $0x8] sm:$0xff]   ;;  %v196_v3 = vld [vmem:[%s269_s1 + $0x10] sm:$0xff]  }
   0x2   :  { %115 = vmatpush1.bf16.msra.mxu0 %v194_v1  ;;  %v197_v4 = vld [vmem:[%s269_s1 + $0x18] sm:$0xff]   ;;  %v205_v5 = vld [vmem:[%s270_s0 + $0x4] ss:$8 sps:$4 sm:$0xff]   ;;  %v200_v10 = vld [vmem:[%s269_s1 + $0x30] sm:$0xff]  }
   0x3   :  { %116 = vmatprep.subr.bf16.mxu0 %v206_v0  ;;  %v35_v6 = vld [vmem:[%s271_s2] sm:$0xff]  ;;  %182 = vmatprep.mubr.msk.bf16.mxu0 %vm110_vm0, %v205_v5  ;;  %v36_v7 = vld [vmem:[%s271_s2 + $0x8] sm:$0xff]  ;;  %v201_v11 = vld [vmem:[%s269_s1 + $0x38] sm:$0xff]  }
   0x4   :  { %39 = vperm.xlu0 %193, %v35_v6   ;;  %v198_v8 = vld [vmem:[%s269_s1 + $0x20] sm:$0xff]   ;;  %v199_v9 = vld [vmem:[%s269_s1 + $0x28] sm:$0xff]  }
   0x5   :  { %v202_v12 = vld [vmem:[%s269_s1 + $0x40] sm:$0xff]  }
   0x6   :  { %117 = vmatpush1.bf16.msra.mxu0 %v195_v2  ;;  %v203_v13 = vld [vmem:[%s270_s0] ss:$8 sps:$4 sm:$0xff]  }
   0x7   :  { %118 = vmatprep.subr.bf16.mxu0 %v206_v0 }
   0x8   :  { %44 = vperm.xlu0 %193, %v36_v7  }
   0xa   :  { %119 = vmatpush1.bf16.msra.mxu0 %v196_v3 }
   0xb   :  { %120 = vmatprep.subr.bf16.mxu0 %v206_v0 }
   0xe   :  { %121 = vmatpush1.bf16.msra.mxu0 %v197_v4 }
   0xf   :  { %122 = vmatprep.subr.bf16.mxu0 %v206_v0 }
  0x12   :  { %123 = vmatpush1.bf16.msra.mxu0 %v198_v8 }
  0x13   :  { %124 = vmatprep.subr.bf16.mxu0 %v206_v0 }
  0x16   :  { %125 = vmatpush1.bf16.msra.mxu0 %v199_v9 }
  0x17   :  { %126 = vmatprep.subr.bf16.mxu0 %v206_v0 }
  0x1a   :  { %127 = vmatpush1.bf16.msra.mxu0 %v200_v10 }
  0x1b   :  { %128 = vmatprep.subr.bf16.mxu0 %v206_v0 }
  0x1e   :  { %129 = vmatpush1.bf16.msra.mxu0 %v201_v11 }
  0x1f   :  { %130 = vmatprep.subr.bf16.mxu0 %v206_v0 }
  0x22   :  { %131 = vmatpush1.bf16.msra.mxu0 %v202_v12 }
  0x25   :  { %147 = vmatmul.mubr.bf16.vlgmr.msra.gmra.mrb[0].mxu0 %v203_v13 }
  0x83   :  { %v40_v14 = vpop.permute.xlu0 %39 }
  0x87   :  { %v45_v18 = vpop.permute.xlu0 %44 }
  0xf8   :  { %v148_v15 = vpop.f32.mrb[0].mxu0 }
  0xf9   :  { %v149_v16 = vadd.f32 %v148_v15, %v40_v14  ;;  %v150_v17 = vpop.f32.mrb[1].mxu0 }
  0xfa   :  { %v151_v19 = vpop.f32.mrb[2].mxu0 }
  0xfb   :  { %v152_v20 = vadd.f32 %v151_v19, %v45_v18  ;;  %v153_v21 = vpop.f32.mrb[3].mxu0  ;;  %v155_v22 = vmax.f32 %v149_v16, 0.0 }
  0xfd   :  { %v156_v23 = vmax.f32 %v152_v20, 0.0 }
  0xff   :  { %v190_v24 = vpack.c.bf16 %v156_v23, %v155_v22 }
 0x101   :  { %191 = vst [vmem:[%s272_s3] sm:$0xff] %v190_v24  }

// kernel: tile.2
= control target key start
LH: loop header
LB: loop body
LE: loop exit
PB: predicated region body
PF: predicated region fallthrough
CT: control target
= control target key end

     0   :  { %vm7_vm0 = vcmask 7168   ;;  %s26_s10 = smov 126   ;;  %s49_s0 = inlined_call_operand.vmem [shape: f32[4,1,1,3], index: 0, kind: input, shape index: {}]   ;;  %s50_s1 = inlined_call_operand.vmem [shape: f32[12,1], index: 1, kind: output, shape index: {}]  }
   0x1   :  { %v4_v0 = vld [vmem:[%s49_s0] sm:$0xf]  ;;  %s25_s0 = smov 127  }
   0x2   :  { %5 = vst [vmem:[#allocation0] sm:$0xf] %v4_v0 }
   0x9   :  { %v9_v1 = vld [vmem:[#allocation0] sm:$0xf]  }
   0xa   :  { %v6_v2 = vld [vmem:[#allocation0] sm:$0xf]   ;;  %10 = vrot.lane.b32.xlu0 %v9_v1, %s25_s0 }
   0xb   :  { %8 = vst.msk [vmem:[%s50_s1] ss:$3 sm:$0xf] %vm7_vm0, %v6_v2   ;;  %v15_v3 = vld [vmem:[#allocation0] sm:$0xf]  }
   0xe   :  { %16 = vrot.lane.b32.xlu0 %v15_v3, %s26_s10 }
  0x7c   :  { %v11_v4 = vpop.permute.xlu0 %10  }
  0x7d   :  { %21 = vst.msk [vmem:[%s50_s1 + $0x1] ss:$3 sm:$0xf] %vm7_vm0, %v11_v4  }
  0x80   :  { %v17_v5 = vpop.permute.xlu0 %16  }
  0x81   :  { %22 = vst.msk [vmem:[%s50_s1 + $0x2] ss:$3 sm:$0xf] %vm7_vm0, %v17_v5  }

// kernel: tile.22
= control target key start
LH: loop header
LB: loop body
LE: loop exit
PB: predicated region body
PF: predicated region fallthrough
CT: control target
= control target key end

     0   :  { %s22_s0 = inlined_call_operand.vmem [shape: f32[3], index: 0, kind: input, shape index: {}]   ;;  %s23_s1 = inlined_call_operand.vmem [shape: f32[4,1,1,3], index: 1, kind: output, shape index: {}]  }
   0x1   :  { %v4_v0 = vld [vmem:[%s22_s0] ss:$0 sm:$0xff] }
   0x2   :  { %5 = vst [vmem:[%s23_s1] sm:$0xf] %v4_v0 }

// kernel: baseline_forward.11
= control target key start
LH: loop header
LB: loop body
LE: loop exit
PB: predicated region body
PF: predicated region fallthrough
CT: control target
= control target key end

     0   :  { %vm61_vm0 = vcmask 1045504   ;;  %vm62_vm1 = vcmask 1046528   ;;  %v145_v0 = vmov 0.0   ;;  %v146_v2 = vmov 65535   ;;  %s193_s1 = inlined_call_operand.vmem [shape: bf16[45,128], index: 1, kind: input, shape index: {}]   ;;  %s194_s2 = inlined_call_operand.vmem [shape: f32[12,1], index: 2, kind: input, shape index: {}]   ;;  %s195_s0 = inlined_call_operand.vmem [shape: bf16[12,45], index: 0, kind: input, shape index: {}]   ;;  %s196_s3 = inlined_call_operand.vmem [shape: f32[12,128], index: 3, kind: output, shape index: {}]  }
   0x1   :  { %126 = vmatprep.subr.bf16.mxu0 %v145_v0  ;;  %v141_v1 = vld [vmem:[%s193_s1] sm:$0xff]   ;;  %v63_v3 = vsel %vm61_vm0, 4294967295, %v146_v2  ;;  %v142_v4 = vld [vmem:[%s193_s1 + $0x8] sm:$0xff]   ;;  %v143_v5 = vld [vmem:[%s193_s1 + $0x10] sm:$0x7f]   ;;  %vm147_vm2 = vmmov 0  }
   0x2   :  { %127 = vmatpush3.bf16.msra.mxu0 %v141_v1  ;;  %v64_v6 = vsel %vm62_vm1, %v63_v3, 0  ;;  %132 = vmatprep.mubr.msk.bf16.mxu0 %vm147_vm2, %v145_v0  ;;  %v23_v7 = vld [vmem:[%s194_s2] sm:$0xff]  ;;  %v148_v8 = vmov 0   ;;  %v24_v10 = vld [vmem:[%s194_s2 + $0x8] sm:$0xf]  ;;  %vm57_vm3 = vcmask 367616  }
   0x3   :  { %128 = vmatprep.subr.bf16.mxu0 %v145_v0  ;;  %140 = vset.pattern.permute.xlu0 %v148_v8  ;;  %v66_v9 = vand.u32 %v143_v5, %v64_v6  ;;  %v144_v11 = vld [vmem:[%s195_s0] sm:$0x3f]  }
   0x4   :  { %27 = vperm.xlu0 %140, %v23_v7  }
   0x6   :  { %129 = vmatpush3.bf16.msra.mxu0 %v142_v4 }
   0x7   :  { %130 = vmatprep.subr.bf16.mxu0 %v145_v0 }
   0x8   :  { %32 = vperm.xlu0 %140, %v24_v10  }
   0xa   :  { %131 = vmatpush3.bf16.msra.mxu0 %v66_v9 }
   0xd   :  { %133 = vmatmul.mubr.msk.bf16.vlgmr.msra.gmra.mrb[0].mxu0 %vm57_vm3, %v144_v11 }
  0x83   :  { %v28_v12 = vpop.permute.xlu0 %27 }
  0x87   :  { %v33_v16 = vpop.permute.xlu0 %32 }
  0xe0   :  { %v102_v13 = vpop.f32.mrb[0].mxu0 }
  0xe1   :  { %v103_v14 = vadd.f32 %v102_v13, %v28_v12  ;;  %v134_v15 = vpop.f32.mrb[1].mxu0 }
  0xe2   :  { %v105_v17 = vpop.f32.mrb[2].mxu0 }
  0xe3   :  { %v109_v18 = vmax.f32 %v103_v14, 0.0  ;;  %v106_v19 = vadd.f32 %v105_v17, %v33_v16  ;;  %v135_v20 = vpop.f32.mrb[3].mxu0 }
  0xe5   :  { %111 = vst [vmem:[%s196_s3] sm:$0xff] %v109_v18  ;;  %v110_v21 = vmax.f32 %v106_v19, 0.0 }
  0xe7   :  { %112 = vst [vmem:[%s196_s3 + $0x8] sm:$0xf] %v110_v21 }

</bundles_post_ra>
